<compile_context>
chip_gen: v5e
topology: v5e:2x2
jax: 0.10.0
libtpu: 0.0.40
codegen_flags: <defaults>
</compile_context>

<pallas_src>
import math
from functools import partial

import jax
import jax.numpy as jnp
from jax.experimental import pallas as pl
from jax.experimental.pallas import tpu as pltpu

WEIGHT_DTYPE = jnp.bfloat16   # bf16 weights: 2x MXU throughput, half weight DMA
COMPUTE_DTYPE = jnp.bfloat16  # dtype of projected Q/K/V activations


def _default_vmem_limit():
    # ~96 MiB on v5e/v6e (128 MiB physical), ~48 MiB on v7x (64 MiB physical).
    try:
        cap = int(pltpu.get_tpu_info().vmem_capacity_bytes)
        return max(32 * 1024 * 1024, min(int(cap * 0.75), 100 * 1024 * 1024))
    except Exception:
        return 64 * 1024 * 1024


VMEM_LIMIT_BYTES = _default_vmem_limit()


# ----------------------------------------------------------------------------
# tiling helpers
# ----------------------------------------------------------------------------
def _row_tile(n, target):
    """Largest divisor of n that is <= target, preferring multiples of 16
    (bf16 sublane packing), falling back to multiples of 8, else n itself."""
    if n <= target:
        return n
    for m in (16, 8):
        best, t = None, m
        while t <= target:
            if n % t == 0:
                best = t
            t += m
        if best is not None:
            return best
    return n


def _col_tile(n, target):
    """Largest divisor of n that is a multiple of 128 and <= target, else n."""
    if n <= target:
        return n
    best, t = None, 128
    while t <= target:
        if n % t == 0:
            best = t
        t += 128
    return best if best is not None else n


def _head_group(num_heads, head_dim, target=256):
    """Heads per grid step: widest group (<= target lanes) whose width is a
    multiple of 8; fall back to all heads (width == d_model, always legal)."""
    best = None
    for cand in range(1, num_heads + 1):
        hw = cand * head_dim
        if num_heads % cand == 0 and hw % 8 == 0 and hw <= target:
            best = cand
    return best if best is not None else num_heads


# ----------------------------------------------------------------------------
# Kernel 1: fused linear projection  y = x @ W + b  (rows tiled)
# ----------------------------------------------------------------------------
def linear_kernel(x_ref, w_ref, b_ref, o_ref):
    y = jnp.dot(x_ref[...].astype(w_ref.dtype), w_ref[...],
                preferred_element_type=jnp.float32)
    o_ref[...] = (y + b_ref[...].astype(jnp.float32)).astype(o_ref.dtype)


def linear_rows(x2d, w, b, out_dtype):
    """y = x2d @ w + b, tiled over rows.  Used for the fused QKV / KV / Q
    projections so K/V are computed exactly once per sequence."""
    R, Din = x2d.shape
    Dout = w.shape[1]
    tr = _row_tile(R, target=512)
    grid = (R // tr,)
    # TODO(synk): add K / output-column tiling for very large d_model so the
    #             full (Din, Dout) weight need not be VMEM resident.
    return pl.pallas_call(
        linear_kernel,
        out_shape=jax.ShapeDtypeStruct((R, Dout), out_dtype),
        grid=grid,
        in_specs=[
            pl.BlockSpec((tr, Din), lambda i: (i, 0)),
            pl.BlockSpec((Din, Dout), lambda i: (0, 0)),   # constant block
            pl.BlockSpec((1, Dout), lambda i: (0, 0)),
        ],
        out_specs=pl.BlockSpec((tr, Dout), lambda i: (i, 0)),
        compiler_params=pltpu.CompilerParams(
            dimension_semantics=("parallel",),
            vmem_limit_bytes=VMEM_LIMIT_BYTES),
    )(x2d, w, b)


# ----------------------------------------------------------------------------
# Kernel 2: attention core (pre-projected Q/K/V) + out-proj + residual + LN
# ----------------------------------------------------------------------------
def attn_core_kernel(q_ref, k_ref, v_ref, res_ref, wo_ref, bo_ref, g_ref, b_ref,
                     o_ref, m_sc, l_sc, ctx_sc, acc_sc, *, hb, hd, scale, eps):
    """Grid (B, q-tiles, head-groups, kv-tiles); last two axes are reductions.

    Per step: online-softmax update for `hb` heads against one KV tile.
    At the last KV tile: normalize ctx and accumulate ctx @ Wo[group] into the
    f32 output accumulator.  At the last head-group: residual + bias + LN.
    """
    hg = pl.program_id(2)
    kv = pl.program_id(3)
    last_hg = pl.num_programs(2) - 1
    last_kv = pl.num_programs(3) - 1

    @pl.when(jnp.logical_and(hg == 0, kv == 0))
    def _():
        acc_sc[...] = jnp.zeros_like(acc_sc)

    @pl.when(kv == 0)
    def _():
        m_sc[...] = jnp.full_like(m_sc, -jnp.inf)
        l_sc[...] = jnp.zeros_like(l_sc)
        ctx_sc[...] = jnp.zeros_like(ctx_sc)

    # Online softmax per head within the group (statically unrolled).
    # NOTE: the reference module applies no attention mask (none exists in the
    # PyTorch spec), so unmasked attention is exact here.
    for j in range(hb):
        qj = q_ref[0, j]                       # (tq, hd) bf16
        kj = k_ref[0, j]                       # (tk, hd) bf16
        vj = v_ref[0, j]                       # (tk, hd) bf16
        s = jax.lax.dot_general(
            qj, kj, (((1,), (1,)), ((), ())),
            preferred_element_type=jnp.float32) * scale      # (tq, tk)
        m_prev = m_sc[j]                                     # (tq, 1)
        m_new = jnp.maximum(m_prev, jnp.max(s, axis=-1, keepdims=True))
        alpha = jnp.exp(m_prev - m_new)
        p = jnp.exp(s - m_new)
        l_sc[j] = alpha * l_sc[j] + jnp.sum(p, axis=-1, keepdims=True)
        col = slice(j * hd, (j + 1) * hd)
        ctx_sc[:, col] = alpha * ctx_sc[:, col] + jnp.dot(
            p.astype(vj.dtype), vj, preferred_element_type=jnp.float32)
        m_sc[j] = m_new
        # TODO(synk): attention-weight dropout is identity (eval mode).

    @pl.when(kv == last_kv)
    def _():
        # Exact softmax normalization (no approx reciprocal), then one wide
        # (tq, hb*hd) @ (hb*hd, D) out-projection accumulate.
        for j in range(hb):
            col = slice(j * hd, (j + 1) * hd)
            ctx_sc[:, col] = ctx_sc[:, col] / l_sc[j]
        acc_sc[...] += jnp.dot(ctx_sc[...].astype(wo_ref.dtype), wo_ref[...],
                               preferred_element_type=jnp.float32)

    @pl.when(jnp.logical_and(hg == last_hg, kv == last_kv))
    def _():
        y = res_ref[0].astype(jnp.float32) + acc_sc[...] \
            + bo_ref[...].astype(jnp.float32)
        mean = jnp.mean(y, axis=-1, keepdims=True)
        var = jnp.mean((y - mean) ** 2, axis=-1, keepdims=True)
        y = (y - mean) * jax.lax.rsqrt(var + eps)
        o_ref[0] = (y * g_ref[...].astype(jnp.float32)
                    + b_ref[...].astype(jnp.float32)).astype(o_ref.dtype)


def mha_add_ln(q_src, kv_src, p, ln_g, ln_b, *, num_heads, is_self, eps=1e-5):
    """LayerNorm(q_src + MHA(q_src, kv_src, kv_src) @ Wo + bo)."""
    B, Sq, D = q_src.shape
    Sk = kv_src.shape[1]
    hd = D // num_heads

    # ---- projections (done once, fused, full matmul width) ----
    if is_self:
        qkv = linear_rows(q_src.reshape(B * Sq, D), p["wqkv"], p["bqkv"],
                          COMPUTE_DTYPE)
        qkv = qkv.reshape(B, Sq, 3, num_heads, hd)
        q4 = qkv[:, :, 0].transpose(0, 2, 1, 3)   # (B, H, Sq, hd)
        k4 = qkv[:, :, 1].transpose(0, 2, 1, 3)
        v4 = qkv[:, :, 2].transpose(0, 2, 1, 3)
    else:
        qp = linear_rows(q_src.reshape(B * Sq, D),
                         p["wqkv"][:, :D], p["bqkv"][:, :D], COMPUTE_DTYPE)
        kvp = linear_rows(kv_src.reshape(B * Sk, D),
                          p["wqkv"][:, D:], p["bqkv"][:, D:], COMPUTE_DTYPE)
        q4 = qp.reshape(B, Sq, num_heads, hd).transpose(0, 2, 1, 3)
        kv5 = kvp.reshape(B, Sk, 2, num_heads, hd)
        k4 = kv5[:, :, 0].transpose(0, 2, 1, 3)
        v4 = kv5[:, :, 1].transpose(0, 2, 1, 3)

    # ---- attention core + out-proj + residual + LayerNorm ----
    hb = _head_group(num_heads, hd)      # heads per grid step (<=256 lanes)
    hw = hb * hd
    n_hg = num_heads // hb
    tq = _row_tile(Sq, target=256)
    tk = _row_tile(Sk, target=512)
    grid = (B, Sq // tq, n_hg, Sk // tk)

    kern = partial(attn_core_kernel, hb=hb, hd=hd,
                   scale=1.0 / math.sqrt(hd), eps=eps)

    # TODO(synk): single-buffer the constant-index bias/LN BlockSpecs
    #             (pipeline_mode=pl.Buffered(1)) once verified on this jax rev.
    return pl.pallas_call(
        kern,
        out_shape=jax.ShapeDtypeStruct((B, Sq, D), q_src.dtype),
        grid=grid,
        in_specs=[
            pl.BlockSpec((1, hb, tq, hd), lambda b, qi, hg, kv: (b, hg, qi, 0)),
            pl.BlockSpec((1, hb, tk, hd), lambda b, qi, hg, kv: (b, hg, kv, 0)),
            pl.BlockSpec((1, hb, tk, hd), lambda b, qi, hg, kv: (b, hg, kv, 0)),
            pl.BlockSpec((1, tq, D), lambda b, qi, hg, kv: (b, qi, 0)),   # residual
            pl.BlockSpec((hw, D), lambda b, qi, hg, kv: (hg, 0)),         # Wo[group]
            pl.BlockSpec((1, D), lambda b, qi, hg, kv: (0, 0)),           # bo
            pl.BlockSpec((1, D), lambda b, qi, hg, kv: (0, 0)),           # ln gamma
            pl.BlockSpec((1, D), lambda b, qi, hg, kv: (0, 0)),           # ln beta
        ],
        out_specs=pl.BlockSpec((1, tq, D), lambda b, qi, hg, kv: (b, qi, 0)),
        scratch_shapes=[
            pltpu.VMEM((hb, tq, 1), jnp.float32),   # running max
            pltpu.VMEM((hb, tq, 1), jnp.float32),   # running denom
            pltpu.VMEM((tq, hw), jnp.float32),      # running context (group)
            pltpu.VMEM((tq, D), jnp.float32),       # output-projection accum
        ],
        compiler_params=pltpu.CompilerParams(
            dimension_semantics=("parallel", "parallel", "arbitrary", "arbitrary"),
            vmem_limit_bytes=VMEM_LIMIT_BYTES),
    )(q4, k4, v4, q_src, p["wo"], p["bo"], ln_g, ln_b)


# ----------------------------------------------------------------------------
# Kernel 3: FFN (F-tiled reduction) + residual + LayerNorm
# ----------------------------------------------------------------------------
def ffn_add_ln_kernel(x_ref, w1_ref, b1_ref, w2_ref, b2_ref, g_ref, b_ref,
                      o_ref, acc_ref, *, eps):
    f = pl.program_id(1)

    @pl.when(f == 0)
    def _():
        acc_ref[...] = jnp.zeros_like(acc_ref)

    x = x_ref[...]
    h = jnp.maximum(
        jnp.dot(x.astype(w1_ref.dtype), w1_ref[...],
                preferred_element_type=jnp.float32)
        + b1_ref[...].astype(jnp.float32), 0.0)
    acc_ref[...] += jnp.dot(h.astype(w2_ref.dtype), w2_ref[...],
                            preferred_element_type=jnp.float32)

    @pl.when(f == pl.num_programs(1) - 1)
    def _():
        y = x_ref[...].astype(jnp.float32) + acc_ref[...] \
            + b2_ref[...].astype(jnp.float32)
        mean = jnp.mean(y, axis=-1, keepdims=True)
        var = jnp.mean((y - mean) ** 2, axis=-1, keepdims=True)
        y = (y - mean) * jax.lax.rsqrt(var + eps)
        o_ref[...] = (y * g_ref[...].astype(jnp.float32)
                      + b_ref[...].astype(jnp.float32)).astype(o_ref.dtype)


def ffn_add_ln(x, w1, b1, w2, b2, ln_g, ln_b, eps=1e-5):
    """y = LayerNorm(x + relu(x@W1+b1)@W2 + b2); rows parallel, F reduced."""
    B, S, D = x.shape
    F = w1.shape[1]
    BS = B * S
    x2 = x.reshape(BS, D)
    tr = _row_tile(BS, target=512)
    tf = _col_tile(F, target=2048)
    grid = (BS // tr, F // tf)

    out = pl.pallas_call(
        partial(ffn_add_ln_kernel, eps=eps),
        out_shape=jax.ShapeDtypeStruct((BS, D), x.dtype),
        grid=grid,
        in_specs=[
            pl.BlockSpec((tr, D), lambda i, f: (i, 0)),
            pl.BlockSpec((D, tf), lambda i, f: (0, f)),
            pl.BlockSpec((1, tf), lambda i, f: (0, f)),
            pl.BlockSpec((tf, D), lambda i, f: (f, 0)),
            pl.BlockSpec((1, D), lambda i, f: (0, 0)),
            pl.BlockSpec((1, D), lambda i, f: (0, 0)),
            pl.BlockSpec((1, D), lambda i, f: (0, 0)),
        ],
        out_specs=pl.BlockSpec((tr, D), lambda i, f: (i, 0)),
        scratch_shapes=[pltpu.VMEM((tr, D), jnp.float32)],
        compiler_params=pltpu.CompilerParams(
            dimension_semantics=("parallel", "arbitrary"),
            vmem_limit_bytes=VMEM_LIMIT_BYTES),
    )(x2, w1, b1, w2, b2, ln_g, ln_b)
    return out.reshape(B, S, D)


# ----------------------------------------------------------------------------
# Parameter init (PyTorch-like uniform(-1/sqrt(fan_in)); weights stored bf16)
# ----------------------------------------------------------------------------
def init_linear(key, fan_in, fan_out):
    kw, kb = jax.random.split(key)
    bound = 1.0 / math.sqrt(fan_in)
    w = jax.random.uniform(kw, (fan_in, fan_out), jnp.float32, -bound, bound)
    b = jax.random.uniform(kb, (fan_out,), jnp.float32, -bound, bound)
    return w.astype(WEIGHT_DTYPE), b


def init_mha(key, d_model, num_heads):
    """Fused [Wq|Wk|Wv] as (D, 3D); column layout within each D block is
    [head, head_dim] (same as PyTorch's view/transpose).  Wo as (D, D) with
    rows in the same [head, head_dim] order."""
    ks = jax.random.split(key, 4)
    wq, bq = init_linear(ks[0], d_model, d_model)
    wk, bk = init_linear(ks[1], d_model, d_model)
    wv, bv = init_linear(ks[2], d_model, d_model)
    wo, bo = init_linear(ks[3], d_model, d_model)
    wqkv = jnp.concatenate([wq, wk, wv], axis=1)                  # (D, 3D) bf16
    bqkv = jnp.concatenate([bq, bk, bv]).reshape(1, 3 * d_model)  # (1, 3D) f32
    return dict(wqkv=wqkv, bqkv=bqkv, wo=wo, bo=bo.reshape(1, d_model))


def init_ln(d_model):
    return (jnp.ones((1, d_model), jnp.float32),
            jnp.zeros((1, d_model), jnp.float32))


def init_encoder_layer(key, d_model, num_heads, dim_ff):
    ks = jax.random.split(key, 3)
    g1, b1 = init_ln(d_model)
    g2, b2 = init_ln(d_model)
    w1, bb1 = init_linear(ks[1], d_model, dim_ff)
    w2, bb2 = init_linear(ks[2], dim_ff, d_model)
    return dict(attn=init_mha(ks[0], d_model, num_heads),
                ff_w1=w1, ff_b1=bb1.reshape(1, dim_ff),
                ff_w2=w2, ff_b2=bb2.reshape(1, d_model),
                ln1_g=g1, ln1_b=b1, ln2_g=g2, ln2_b=b2)


def init_decoder_layer(key, d_model, num_heads, dim_ff):
    ks = jax.random.split(key, 4)
    g1, b1 = init_ln(d_model)
    g2, b2 = init_ln(d_model)
    g3, b3 = init_ln(d_model)
    w1, bb1 = init_linear(ks[2], d_model, dim_ff)
    w2, bb2 = init_linear(ks[3], dim_ff, d_model)
    return dict(self_attn=init_mha(ks[0], d_model, num_heads),
                cross_attn=init_mha(ks[1], d_model, num_heads),
                ff_w1=w1, ff_b1=bb1.reshape(1, dim_ff),
                ff_w2=w2, ff_b2=bb2.reshape(1, d_model),
                ln1_g=g1, ln1_b=b1, ln2_g=g2, ln2_b=b2, ln3_g=g3, ln3_b=b3)


# ----------------------------------------------------------------------------
# Transformer forward (glue in JAX, compute inside Pallas kernels)
# ----------------------------------------------------------------------------
def encoder_layer_fwd(src, p, num_heads):
    src = mha_add_ln(src, src, p["attn"], p["ln1_g"], p["ln1_b"],
                     num_heads=num_heads, is_self=True)
    src = ffn_add_ln(src, p["ff_w1"], p["ff_b1"], p["ff_w2"], p["ff_b2"],
                     p["ln2_g"], p["ln2_b"])
    return src


def decoder_layer_fwd(tgt, memory, p, num_heads):
    tgt = mha_add_ln(tgt, tgt, p["self_attn"], p["ln1_g"], p["ln1_b"],
                     num_heads=num_heads, is_self=True)
    tgt = mha_add_ln(tgt, memory, p["cross_attn"], p["ln2_g"], p["ln2_b"],
                     num_heads=num_heads, is_self=False)
    tgt = ffn_add_ln(tgt, p["ff_w1"], p["ff_b1"], p["ff_w2"], p["ff_b2"],
                     p["ln3_g"], p["ln3_b"])
    return tgt


def transformer_fwd(src, tgt, params, num_heads):
    memory = src
    for p in params["encoder"]:
        memory = encoder_layer_fwd(memory, p, num_heads)
    out = tgt
    for p in params["decoder"]:
        out = decoder_layer_fwd(out, memory, p, num_heads)
    return out


# ----------------------------------------------------------------------------
if __name__ == "__main__":
    num_encoder_layers = 2
    num_decoder_layers = 2
    d_model = 32
    num_heads = 4
    dim_feedforward = 64
    batch = 2
    src_len = 8
    tgt_len = 8

    root = jax.random.PRNGKey(0)
    k_src, k_tgt, k_params = jax.random.split(root, 3)

    src = jax.random.normal(k_src, (batch, src_len, d_model), jnp.float32)
    tgt = jax.random.normal(k_tgt, (batch, tgt_len, d_model), jnp.float32)

    enc_keys = jax.random.split(jax.random.fold_in(k_params, 0), num_encoder_layers)
    dec_keys = jax.random.split(jax.random.fold_in(k_params, 1), num_decoder_layers)
    params = dict(
        encoder=[init_encoder_layer(k, d_model, num_heads, dim_feedforward)
                 for k in enc_keys],
        decoder=[init_decoder_layer(k, d_model, num_heads, dim_feedforward)
                 for k in dec_keys],
    )

    out = jax.jit(partial(transformer_fwd, num_heads=num_heads))(src, tgt, params)
    jax.block_until_ready(out)
    assert out.shape == (batch, tgt_len, d_model)
    assert bool(jnp.all(jnp.isfinite(out)))
    print("KERNEL_OK")
</pallas_src>

<mosaic_0001>
module attributes {stable_mosaic.version = 11 : i64} {
  func.func @linear_kernel(%arg0: i32, %arg1: memref<16x32xf32, #tpu.memory_space<vmem>>, %arg2: memref<32x96xbf16, #tpu.memory_space<vmem>>, %arg3: memref<1x96xf32, #tpu.memory_space<vmem>>, %arg4: memref<16x96xbf16, #tpu.memory_space<vmem>>) attributes {dimension_semantics = [#tpu.dimension_semantics<parallel>], iteration_bounds = array<i64: 1>, scalar_prefetch = 0 : i64, scratch_operands = 0 : i64, tpu.core_type = #tpu.core_type<tc>, window_params = [{transform_indices = @transform_0, window_bounds = array<i64: 16, 32>}, {pipeline_mode = #tpu.pipeline_mode<synchronous>, transform_indices = @transform_1, window_bounds = array<i64: 32, 96>}, {pipeline_mode = #tpu.pipeline_mode<synchronous>, transform_indices = @transform_2, window_bounds = array<i64: 1, 96>}, {transform_indices = @transform_3, window_bounds = array<i64: 16, 96>}]} {
    %c0 = arith.constant 0 : index
    %c0_0 = arith.constant 0 : index
    %0 = vector.load %arg1[%c0, %c0_0] : memref<16x32xf32, #tpu.memory_space<vmem>>, vector<16x32xf32>
    %1 = arith.truncf %0 : vector<16x32xf32> to vector<16x32xbf16>
    %c0_1 = arith.constant 0 : index
    %c0_2 = arith.constant 0 : index
    %2 = vector.load %arg2[%c0_1, %c0_2] : memref<32x96xbf16, #tpu.memory_space<vmem>>, vector<32x96xbf16>
    %cst = arith.constant dense<0.000000e+00> : vector<16x96xf32>
    %3 = tpu.matmul %1, %2, %cst {dimension_numbers = #tpu.dot_dimension_numbers<[1], [0], [0], [1], [0, 0, 1, 1], [], []>} : vector<16x32xbf16>, vector<32x96xbf16>, vector<16x96xf32> -> vector<16x96xf32>
    %c0_3 = arith.constant 0 : index
    %c0_4 = arith.constant 0 : index
    %4 = vector.load %arg3[%c0_3, %c0_4] : memref<1x96xf32, #tpu.memory_space<vmem>>, vector<1x96xf32>
    %5 = vector.broadcast %4 : vector<1x96xf32> to vector<16x96xf32>
    %6 = arith.addf %3, %5 : vector<16x96xf32>
    %7 = arith.truncf %6 : vector<16x96xf32> to vector<16x96xbf16>
    %c0_5 = arith.constant 0 : index
    %c0_6 = arith.constant 0 : index
    %8 = vector.load %arg4[%c0_5, %c0_6] : memref<16x96xbf16, #tpu.memory_space<vmem>>, vector<16x96xbf16>
    tpu.vector_store %arg4[%c0_5, %c0_6], %7 {strides = array<i32>} : memref<16x96xbf16, #tpu.memory_space<vmem>>, vector<16x96xbf16>,
    return
  }
  func.func @transform_0(%arg0: i32) -> (i32, i32) {
    %c0_i32 = arith.constant 0 : i32
    %c0_i32_0 = arith.constant 0 : i32
    return %arg0, %c0_i32 : i32, i32
  }
  func.func @transform_1(%arg0: i32) -> (i32, i32) {
    %c0_i32 = arith.constant 0 : i32
    %c0_i32_0 = arith.constant 0 : i32
    %c0_i32_1 = arith.constant 0 : i32
    return %c0_i32, %c0_i32_0 : i32, i32
  }
  func.func @transform_2(%arg0: i32) -> (i32, i32) {
    %c0_i32 = arith.constant 0 : i32
    %c0_i32_0 = arith.constant 0 : i32
    %c0_i32_1 = arith.constant 0 : i32
    return %c0_i32, %c0_i32_0 : i32, i32
  }
  func.func @transform_3(%arg0: i32) -> (i32, i32) {
    %c0_i32 = arith.constant 0 : i32
    %c0_i32_0 = arith.constant 0 : i32
    return %arg0, %c0_i32 : i32, i32
  }
}

module attributes {stable_mosaic.version = 11 : i64} {
  func.func @linear_kernel(%arg0: i32, %arg1: memref<16x32xf32, #tpu.memory_space<vmem>>, %arg2: memref<32x32xbf16, #tpu.memory_space<vmem>>, %arg3: memref<1x32xf32, #tpu.memory_space<vmem>>, %arg4: memref<16x32xbf16, #tpu.memory_space<vmem>>) attributes {dimension_semantics = [#tpu.dimension_semantics<parallel>], iteration_bounds = array<i64: 1>, scalar_prefetch = 0 : i64, scratch_operands = 0 : i64, tpu.core_type = #tpu.core_type<tc>, window_params = [{transform_indices = @transform_0, window_bounds = array<i64: 16, 32>}, {pipeline_mode = #tpu.pipeline_mode<synchronous>, transform_indices = @transform_1, window_bounds = array<i64: 32, 32>}, {pipeline_mode = #tpu.pipeline_mode<synchronous>, transform_indices = @transform_2, window_bounds = array<i64: 1, 32>}, {transform_indices = @transform_3, window_bounds = array<i64: 16, 32>}]} {
    %c0 = arith.constant 0 : index
    %c0_0 = arith.constant 0 : index
    %0 = vector.load %arg1[%c0, %c0_0] : memref<16x32xf32, #tpu.memory_space<vmem>>, vector<16x32xf32>
    %1 = arith.truncf %0 : vector<16x32xf32> to vector<16x32xbf16>
    %c0_1 = arith.constant 0 : index
    %c0_2 = arith.constant 0 : index
    %2 = vector.load %arg2[%c0_1, %c0_2] : memref<32x32xbf16, #tpu.memory_space<vmem>>, vector<32x32xbf16>
    %cst = arith.constant dense<0.000000e+00> : vector<16x32xf32>
    %3 = tpu.matmul %1, %2, %cst {dimension_numbers = #tpu.dot_dimension_numbers<[1], [0], [0], [1], [0, 0, 1, 1], [], []>} : vector<16x32xbf16>, vector<32x32xbf16>, vector<16x32xf32> -> vector<16x32xf32>
    %c0_3 = arith.constant 0 : index
    %c0_4 = arith.constant 0 : index
    %4 = vector.load %arg3[%c0_3, %c0_4] : memref<1x32xf32, #tpu.memory_space<vmem>>, vector<1x32xf32>
    %5 = vector.broadcast %4 : vector<1x32xf32> to vector<16x32xf32>
    %6 = arith.addf %3, %5 : vector<16x32xf32>
    %7 = arith.truncf %6 : vector<16x32xf32> to vector<16x32xbf16>
    %c0_5 = arith.constant 0 : index
    %c0_6 = arith.constant 0 : index
    %8 = vector.load %arg4[%c0_5, %c0_6] : memref<16x32xbf16, #tpu.memory_space<vmem>>, vector<16x32xbf16>
    tpu.vector_store %arg4[%c0_5, %c0_6], %7 {strides = array<i32>} : memref<16x32xbf16, #tpu.memory_space<vmem>>, vector<16x32xbf16>,
    return
  }
  func.func @transform_0(%arg0: i32) -> (i32, i32) {
    %c0_i32 = arith.constant 0 : i32
    %c0_i32_0 = arith.constant 0 : i32
    return %arg0, %c0_i32 : i32, i32
  }
  func.func @transform_1(%arg0: i32) -> (i32, i32) {
    %c0_i32 = arith.constant 0 : i32
    %c0_i32_0 = arith.constant 0 : i32
    %c0_i32_1 = arith.constant 0 : i32
    return %c0_i32, %c0_i32_0 : i32, i32
  }
  func.func @transform_2(%arg0: i32) -> (i32, i32) {
    %c0_i32 = arith.constant 0 : i32
    %c0_i32_0 = arith.constant 0 : i32
    %c0_i32_1 = arith.constant 0 : i32
    return %c0_i32, %c0_i32_0 : i32, i32
  }
  func.func @transform_3(%arg0: i32) -> (i32, i32) {
    %c0_i32 = arith.constant 0 : i32
    %c0_i32_0 = arith.constant 0 : i32
    return %arg0, %c0_i32 : i32, i32
  }
}

module attributes {stable_mosaic.version = 11 : i64} {
  func.func @attn_core_kernel(%arg0: i32, %arg1: i32, %arg2: i32, %arg3: i32, %arg4: memref<1x4x8x8xbf16, #tpu.memory_space<vmem>>, %arg5: memref<1x4x8x8xbf16, #tpu.memory_space<vmem>>, %arg6: memref<1x4x8x8xbf16, #tpu.memory_space<vmem>>, %arg7: memref<1x8x32xf32, #tpu.memory_space<vmem>>, %arg8: memref<32x32xbf16, #tpu.memory_space<vmem>>, %arg9: memref<1x32xf32, #tpu.memory_space<vmem>>, %arg10: memref<1x32xf32, #tpu.memory_space<vmem>>, %arg11: memref<1x32xf32, #tpu.memory_space<vmem>>, %arg12: memref<1x8x32xf32, #tpu.memory_space<vmem>>, %arg13: memref<4x8x1xf32, #tpu.memory_space<vmem>>, %arg14: memref<4x8x1xf32, #tpu.memory_space<vmem>>, %arg15: memref<8x32xf32, #tpu.memory_space<vmem>>, %arg16: memref<8x32xf32, #tpu.memory_space<vmem>>) attributes {dimension_semantics = [#tpu.dimension_semantics<parallel>, #tpu.dimension_semantics<parallel>, #tpu.dimension_semantics<arbitrary>, #tpu.dimension_semantics<arbitrary>], iteration_bounds = array<i64: 2, 1, 1, 1>, scalar_prefetch = 0 : i64, scratch_operands = 4 : i64, tpu.core_type = #tpu.core_type<tc>, window_params = [{transform_indices = @transform_0, window_bounds = array<i64: 1, 4, 8, 8>}, {transform_indices = @transform_1, window_bounds = array<i64: 1, 4, 8, 8>}, {transform_indices = @transform_2, window_bounds = array<i64: 1, 4, 8, 8>}, {transform_indices = @transform_3, window_bounds = array<i64: 1, 8, 32>}, {transform_indices = @transform_4, window_bounds = array<i64: 32, 32>}, {pipeline_mode = #tpu.pipeline_mode<synchronous>, transform_indices = @transform_5, window_bounds = array<i64: 1, 32>}, {pipeline_mode = #tpu.pipeline_mode<synchronous>, transform_indices = @transform_6, window_bounds = array<i64: 1, 32>}, {pipeline_mode = #tpu.pipeline_mode<synchronous>, transform_indices = @transform_7, window_bounds = array<i64: 1, 32>}, {transform_indices = @transform_8, window_bounds = array<i64: 1, 8, 32>}]} {
    %c0_i32 = arith.constant 0 : i32
    %0 = arith.cmpi eq, %arg2, %c0_i32 : i32
    %c0_i32_0 = arith.constant 0 : i32
    %1 = arith.cmpi eq, %arg3, %c0_i32_0 : i32
    %2 = arith.andi %0, %1 : i1
    %3 = arith.extui %2 : i1 to i32
    %c0_i32_1 = arith.constant 0 : i32
    %4 = arith.cmpi ne, %3, %c0_i32_1 : i32
    scf.if %4 {
      %cst_133 = arith.constant 0.000000e+00 : f32
      %168 = vector.broadcast %cst_133 : f32 to vector<8x32xf32>
      %c0_134 = arith.constant 0 : index
      %c0_135 = arith.constant 0 : index
      %169 = vector.load %arg16[%c0_134, %c0_135] : memref<8x32xf32, #tpu.memory_space<vmem>>, vector<8x32xf32>
      tpu.vector_store %arg16[%c0_134, %c0_135], %168 {strides = array<i32>} : memref<8x32xf32, #tpu.memory_space<vmem>>, vector<8x32xf32>,
    } else {
    }
    %c0_i32_2 = arith.constant 0 : i32
    %5 = arith.cmpi eq, %arg3, %c0_i32_2 : i32
    %6 = arith.extui %5 : i1 to i32
    %c0_i32_3 = arith.constant 0 : i32
    %7 = arith.cmpi ne, %6, %c0_i32_3 : i32
    scf.if %7 {
      %cst_133 = arith.constant 0xFF800000 : f32
      %168 = vector.broadcast %cst_133 : f32 to vector<4x8x1xf32>
      %c0_134 = arith.constant 0 : index
      %c0_135 = arith.constant 0 : index
      %c0_136 = arith.constant 0 : index
      %169 = vector.load %arg13[%c0_134, %c0_135, %c0_136] : memref<4x8x1xf32, #tpu.memory_space<vmem>>, vector<4x8x1xf32>
      tpu.vector_store %arg13[%c0_134, %c0_135, %c0_136], %168 {strides = array<i32>} : memref<4x8x1xf32, #tpu.memory_space<vmem>>, vector<4x8x1xf32>,
      %cst_137 = arith.constant 0.000000e+00 : f32
      %170 = vector.broadcast %cst_137 : f32 to vector<4x8x1xf32>
      %c0_138 = arith.constant 0 : index
      %c0_139 = arith.constant 0 : index
      %c0_140 = arith.constant 0 : index
      %171 = vector.load %arg14[%c0_138, %c0_139, %c0_140] : memref<4x8x1xf32, #tpu.memory_space<vmem>>, vector<4x8x1xf32>
      tpu.vector_store %arg14[%c0_138, %c0_139, %c0_140], %170 {strides = array<i32>} : memref<4x8x1xf32, #tpu.memory_space<vmem>>, vector<4x8x1xf32>,
      %cst_141 = arith.constant 0.000000e+00 : f32
      %172 = vector.broadcast %cst_141 : f32 to vector<8x32xf32>
      %c0_142 = arith.constant 0 : index
      %c0_143 = arith.constant 0 : index
      %173 = vector.load %arg15[%c0_142, %c0_143] : memref<8x32xf32, #tpu.memory_space<vmem>>, vector<8x32xf32>
      tpu.vector_store %arg15[%c0_142, %c0_143], %172 {strides = array<i32>} : memref<8x32xf32, #tpu.memory_space<vmem>>, vector<8x32xf32>,
    } else {
    }
    %c0 = arith.constant 0 : index
    %c0_4 = arith.constant 0 : index
    %c0_5 = arith.constant 0 : index
    %c0_6 = arith.constant 0 : index
    %8 = vector.load %arg4[%c0, %c0_4, %c0_5, %c0_6] : memref<1x4x8x8xbf16, #tpu.memory_space<vmem>>, vector<1x1x8x8xbf16>
    %9 = vector.shape_cast %8 : vector<1x1x8x8xbf16> to vector<8x8xbf16>
    %c0_7 = arith.constant 0 : index
    %c0_8 = arith.constant 0 : index
    %c0_9 = arith.constant 0 : index
    %c0_10 = arith.constant 0 : index
    %10 = vector.load %arg5[%c0_7, %c0_8, %c0_9, %c0_10] : memref<1x4x8x8xbf16, #tpu.memory_space<vmem>>, vector<1x1x8x8xbf16>
    %11 = vector.shape_cast %10 : vector<1x1x8x8xbf16> to vector<8x8xbf16>
    %c0_11 = arith.constant 0 : index
    %c0_12 = arith.constant 0 : index
    %c0_13 = arith.constant 0 : index
    %c0_14 = arith.constant 0 : index
    %12 = vector.load %arg6[%c0_11, %c0_12, %c0_13, %c0_14] : memref<1x4x8x8xbf16, #tpu.memory_space<vmem>>, vector<1x1x8x8xbf16>
    %13 = vector.shape_cast %12 : vector<1x1x8x8xbf16> to vector<8x8xbf16>
    %cst = arith.constant dense<0.000000e+00> : vector<8x8xf32>
    %14 = tpu.matmul %9, %11, %cst {dimension_numbers = #tpu.dot_dimension_numbers<[1], [1], [0], [0], [0, 0, 1, 0], [], []>} : vector<8x8xbf16>, vector<8x8xbf16>, vector<8x8xf32> -> vector<8x8xf32>
    %cst_15 = arith.constant 0.353553385 : f32
    %15 = vector.broadcast %cst_15 : f32 to vector<8x8xf32>
    %16 = arith.mulf %14, %15 : vector<8x8xf32>
    %c0_16 = arith.constant 0 : index
    %c0_17 = arith.constant 0 : index
    %c0_18 = arith.constant 0 : index
    %17 = vector.load %arg13[%c0_16, %c0_17, %c0_18] : memref<4x8x1xf32, #tpu.memory_space<vmem>>, vector<1x8x1xf32>
    %18 = vector.shape_cast %17 : vector<1x8x1xf32> to vector<8x1xf32>
    %cst_19 = arith.constant dense<0xFF800000> : vector<8xf32>
    %19 = vector.multi_reduction <maximumf>, %16, %cst_19 [1] : vector<8x8xf32> to vector<8xf32>
    %20 = vector.shape_cast %19 : vector<8xf32> to vector<8x1xf32>
    %21 = arith.maximumf %18, %20 : vector<8x1xf32>
    %22 = arith.subf %18, %21 : vector<8x1xf32>
    %23 = math.exp %22 : vector<8x1xf32>
    %24 = vector.broadcast %21 : vector<8x1xf32> to vector<8x8xf32>
    %25 = arith.subf %16, %24 : vector<8x8xf32>
    %26 = math.exp %25 : vector<8x8xf32>
    %c0_20 = arith.constant 0 : index
    %c0_21 = arith.constant 0 : index
    %c0_22 = arith.constant 0 : index
    %27 = vector.load %arg14[%c0_20, %c0_21, %c0_22] : memref<4x8x1xf32, #tpu.memory_space<vmem>>, vector<1x8x1xf32>
    %28 = vector.shape_cast %27 : vector<1x8x1xf32> to vector<8x1xf32>
    %29 = arith.mulf %23, %28 : vector<8x1xf32>
    %cst_23 = arith.constant dense<0.000000e+00> : vector<8xf32>
    %30 = vector.multi_reduction <add>, %26, %cst_23 [1] : vector<8x8xf32> to vector<8xf32>
    %31 = vector.shape_cast %30 : vector<8xf32> to vector<8x1xf32>
    %32 = arith.addf %29, %31 : vector<8x1xf32>
    %c0_24 = arith.constant 0 : index
    %c0_25 = arith.constant 0 : index
    %c0_26 = arith.constant 0 : index
    %33 = vector.load %arg14[%c0_24, %c0_25, %c0_26] : memref<4x8x1xf32, #tpu.memory_space<vmem>>, vector<1x8x1xf32>
    %34 = vector.shape_cast %33 : vector<1x8x1xf32> to vector<8x1xf32>
    %35 = vector.shape_cast %32 : vector<8x1xf32> to vector<1x8x1xf32>
    tpu.vector_store %arg14[%c0_24, %c0_25, %c0_26], %35 {strides = array<i32>} : memref<4x8x1xf32, #tpu.memory_space<vmem>>, vector<1x8x1xf32>,
    %c0_27 = arith.constant 0 : index
    %c0_28 = arith.constant 0 : index
    %36 = vector.load %arg15[%c0_27, %c0_28] : memref<8x32xf32, #tpu.memory_space<vmem>>, vector<8x8xf32>
    %37 = vector.broadcast %23 : vector<8x1xf32> to vector<8x8xf32>
    %38 = arith.mulf %37, %36 : vector<8x8xf32>
    %39 = arith.truncf %26 : vector<8x8xf32> to vector<8x8xbf16>
    %cst_29 = arith.constant dense<0.000000e+00> : vector<8x8xf32>
    %40 = tpu.matmul %39, %13, %cst_29 {dimension_numbers = #tpu.dot_dimension_numbers<[1], [0], [0], [1], [0, 0, 1, 1], [], []>} : vector<8x8xbf16>, vector<8x8xbf16>, vector<8x8xf32> -> vector<8x8xf32>
    %41 = arith.addf %38, %40 : vector<8x8xf32>
    %c0_30 = arith.constant 0 : index
    %c0_31 = arith.constant 0 : index
    %42 = vector.load %arg15[%c0_30, %c0_31] : memref<8x32xf32, #tpu.memory_space<vmem>>, vector<8x8xf32>
    tpu.vector_store %arg15[%c0_30, %c0_31], %41 {strides = array<i32>} : memref<8x32xf32, #tpu.memory_space<vmem>>, vector<8x8xf32>,
    %c0_32 = arith.constant 0 : index
    %c0_33 = arith.constant 0 : index
    %c0_34 = arith.constant 0 : index
    %43 = vector.load %arg13[%c0_32, %c0_33, %c0_34] : memref<4x8x1xf32, #tpu.memory_space<vmem>>, vector<1x8x1xf32>
    %44 = vector.shape_cast %43 : vector<1x8x1xf32> to vector<8x1xf32>
    %45 = vector.shape_cast %21 : vector<8x1xf32> to vector<1x8x1xf32>
    tpu.vector_store %arg13[%c0_32, %c0_33, %c0_34], %45 {strides = array<i32>} : memref<4x8x1xf32, #tpu.memory_space<vmem>>, vector<1x8x1xf32>,
    %c0_35 = arith.constant 0 : index
    %c1 = arith.constant 1 : index
    %c0_36 = arith.constant 0 : index
    %c0_37 = arith.constant 0 : index
    %46 = vector.load %arg4[%c0_35, %c1, %c0_36, %c0_37] : memref<1x4x8x8xbf16, #tpu.memory_space<vmem>>, vector<1x1x8x8xbf16>
    %47 = vector.shape_cast %46 : vector<1x1x8x8xbf16> to vector<8x8xbf16>
    %c0_38 = arith.constant 0 : index
    %c1_39 = arith.constant 1 : index
    %c0_40 = arith.constant 0 : index
    %c0_41 = arith.constant 0 : index
    %48 = vector.load %arg5[%c0_38, %c1_39, %c0_40, %c0_41] : memref<1x4x8x8xbf16, #tpu.memory_space<vmem>>, vector<1x1x8x8xbf16>
    %49 = vector.shape_cast %48 : vector<1x1x8x8xbf16> to vector<8x8xbf16>
    %c0_42 = arith.constant 0 : index
    %c1_43 = arith.constant 1 : index
    %c0_44 = arith.constant 0 : index
    %c0_45 = arith.constant 0 : index
    %50 = vector.load %arg6[%c0_42, %c1_43, %c0_44, %c0_45] : memref<1x4x8x8xbf16, #tpu.memory_space<vmem>>, vector<1x1x8x8xbf16>
    %51 = vector.shape_cast %50 : vector<1x1x8x8xbf16> to vector<8x8xbf16>
    %cst_46 = arith.constant dense<0.000000e+00> : vector<8x8xf32>
    %52 = tpu.matmul %47, %49, %cst_46 {dimension_numbers = #tpu.dot_dimension_numbers<[1], [1], [0], [0], [0, 0, 1, 0], [], []>} : vector<8x8xbf16>, vector<8x8xbf16>, vector<8x8xf32> -> vector<8x8xf32>
    %cst_47 = arith.constant 0.353553385 : f32
    %53 = vector.broadcast %cst_47 : f32 to vector<8x8xf32>
    %54 = arith.mulf %52, %53 : vector<8x8xf32>
    %c1_48 = arith.constant 1 : index
    %c0_49 = arith.constant 0 : index
    %c0_50 = arith.constant 0 : index
    %55 = vector.load %arg13[%c1_48, %c0_49, %c0_50] : memref<4x8x1xf32, #tpu.memory_space<vmem>>, vector<1x8x1xf32>
    %56 = vector.shape_cast %55 : vector<1x8x1xf32> to vector<8x1xf32>
    %cst_51 = arith.constant dense<0xFF800000> : vector<8xf32>
    %57 = vector.multi_reduction <maximumf>, %54, %cst_51 [1] : vector<8x8xf32> to vector<8xf32>
    %58 = vector.shape_cast %57 : vector<8xf32> to vector<8x1xf32>
    %59 = arith.maximumf %56, %58 : vector<8x1xf32>
    %60 = arith.subf %56, %59 : vector<8x1xf32>
    %61 = math.exp %60 : vector<8x1xf32>
    %62 = vector.broadcast %59 : vector<8x1xf32> to vector<8x8xf32>
    %63 = arith.subf %54, %62 : vector<8x8xf32>
    %64 = math.exp %63 : vector<8x8xf32>
    %c1_52 = arith.constant 1 : index
    %c0_53 = arith.constant 0 : index
    %c0_54 = arith.constant 0 : index
    %65 = vector.load %arg14[%c1_52, %c0_53, %c0_54] : memref<4x8x1xf32, #tpu.memory_space<vmem>>, vector<1x8x1xf32>
    %66 = vector.shape_cast %65 : vector<1x8x1xf32> to vector<8x1xf32>
    %67 = arith.mulf %61, %66 : vector<8x1xf32>
    %cst_55 = arith.constant dense<0.000000e+00> : vector<8xf32>
    %68 = vector.multi_reduction <add>, %64, %cst_55 [1] : vector<8x8xf32> to vector<8xf32>
    %69 = vector.shape_cast %68 : vector<8xf32> to vector<8x1xf32>
    %70 = arith.addf %67, %69 : vector<8x1xf32>
    %c1_56 = arith.constant 1 : index
    %c0_57 = arith.constant 0 : index
    %c0_58 = arith.constant 0 : index
    %71 = vector.load %arg14[%c1_56, %c0_57, %c0_58] : memref<4x8x1xf32, #tpu.memory_space<vmem>>, vector<1x8x1xf32>
    %72 = vector.shape_cast %71 : vector<1x8x1xf32> to vector<8x1xf32>
    %73 = vector.shape_cast %70 : vector<8x1xf32> to vector<1x8x1xf32>
    tpu.vector_store %arg14[%c1_56, %c0_57, %c0_58], %73 {strides = array<i32>} : memref<4x8x1xf32, #tpu.memory_space<vmem>>, vector<1x8x1xf32>,
    %c0_59 = arith.constant 0 : index
    %c8 = arith.constant 8 : index
    %74 = vector.load %arg15[%c0_59, %c8] : memref<8x32xf32, #tpu.memory_space<vmem>>, vector<8x8xf32>
    %75 = vector.broadcast %61 : vector<8x1xf32> to vector<8x8xf32>
    %76 = arith.mulf %75, %74 : vector<8x8xf32>
    %77 = arith.truncf %64 : vector<8x8xf32> to vector<8x8xbf16>
    %cst_60 = arith.constant dense<0.000000e+00> : vector<8x8xf32>
    %78 = tpu.matmul %77, %51, %cst_60 {dimension_numbers = #tpu.dot_dimension_numbers<[1], [0], [0], [1], [0, 0, 1, 1], [], []>} : vector<8x8xbf16>, vector<8x8xbf16>, vector<8x8xf32> -> vector<8x8xf32>
    %79 = arith.addf %76, %78 : vector<8x8xf32>
    %c0_61 = arith.constant 0 : index
    %c8_62 = arith.constant 8 : index
    %80 = vector.load %arg15[%c0_61, %c8_62] : memref<8x32xf32, #tpu.memory_space<vmem>>, vector<8x8xf32>
    tpu.vector_store %arg15[%c0_61, %c8_62], %79 {strides = array<i32>} : memref<8x32xf32, #tpu.memory_space<vmem>>, vector<8x8xf32>,
    %c1_63 = arith.constant 1 : index
    %c0_64 = arith.constant 0 : index
    %c0_65 = arith.constant 0 : index
    %81 = vector.load %arg13[%c1_63, %c0_64, %c0_65] : memref<4x8x1xf32, #tpu.memory_space<vmem>>, vector<1x8x1xf32>
    %82 = vector.shape_cast %81 : vector<1x8x1xf32> to vector<8x1xf32>
    %83 = vector.shape_cast %59 : vector<8x1xf32> to vector<1x8x1xf32>
    tpu.vector_store %arg13[%c1_63, %c0_64, %c0_65], %83 {strides = array<i32>} : memref<4x8x1xf32, #tpu.memory_space<vmem>>, vector<1x8x1xf32>,
    %c0_66 = arith.constant 0 : index
    %c2 = arith.constant 2 : index
    %c0_67 = arith.constant 0 : index
    %c0_68 = arith.constant 0 : index
    %84 = vector.load %arg4[%c0_66, %c2, %c0_67, %c0_68] : memref<1x4x8x8xbf16, #tpu.memory_space<vmem>>, vector<1x1x8x8xbf16>
    %85 = vector.shape_cast %84 : vector<1x1x8x8xbf16> to vector<8x8xbf16>
    %c0_69 = arith.constant 0 : index
    %c2_70 = arith.constant 2 : index
    %c0_71 = arith.constant 0 : index
    %c0_72 = arith.constant 0 : index
    %86 = vector.load %arg5[%c0_69, %c2_70, %c0_71, %c0_72] : memref<1x4x8x8xbf16, #tpu.memory_space<vmem>>, vector<1x1x8x8xbf16>
    %87 = vector.shape_cast %86 : vector<1x1x8x8xbf16> to vector<8x8xbf16>
    %c0_73 = arith.constant 0 : index
    %c2_74 = arith.constant 2 : index
    %c0_75 = arith.constant 0 : index
    %c0_76 = arith.constant 0 : index
    %88 = vector.load %arg6[%c0_73, %c2_74, %c0_75, %c0_76] : memref<1x4x8x8xbf16, #tpu.memory_space<vmem>>, vector<1x1x8x8xbf16>
    %89 = vector.shape_cast %88 : vector<1x1x8x8xbf16> to vector<8x8xbf16>
    %cst_77 = arith.constant dense<0.000000e+00> : vector<8x8xf32>
    %90 = tpu.matmul %85, %87, %cst_77 {dimension_numbers = #tpu.dot_dimension_numbers<[1], [1], [0], [0], [0, 0, 1, 0], [], []>} : vector<8x8xbf16>, vector<8x8xbf16>, vector<8x8xf32> -> vector<8x8xf32>
    %cst_78 = arith.constant 0.353553385 : f32
    %91 = vector.broadcast %cst_78 : f32 to vector<8x8xf32>
    %92 = arith.mulf %90, %91 : vector<8x8xf32>
    %c2_79 = arith.constant 2 : index
    %c0_80 = arith.constant 0 : index
    %c0_81 = arith.constant 0 : index
    %93 = vector.load %arg13[%c2_79, %c0_80, %c0_81] : memref<4x8x1xf32, #tpu.memory_space<vmem>>, vector<1x8x1xf32>
    %94 = vector.shape_cast %93 : vector<1x8x1xf32> to vector<8x1xf32>
    %cst_82 = arith.constant dense<0xFF800000> : vector<8xf32>
    %95 = vector.multi_reduction <maximumf>, %92, %cst_82 [1] : vector<8x8xf32> to vector<8xf32>
    %96 = vector.shape_cast %95 : vector<8xf32> to vector<8x1xf32>
    %97 = arith.maximumf %94, %96 : vector<8x1xf32>
    %98 = arith.subf %94, %97 : vector<8x1xf32>
    %99 = math.exp %98 : vector<8x1xf32>
    %100 = vector.broadcast %97 : vector<8x1xf32> to vector<8x8xf32>
    %101 = arith.subf %92, %100 : vector<8x8xf32>
    %102 = math.exp %101 : vector<8x8xf32>
    %c2_83 = arith.constant 2 : index
    %c0_84 = arith.constant 0 : index
    %c0_85 = arith.constant 0 : index
    %103 = vector.load %arg14[%c2_83, %c0_84, %c0_85] : memref<4x8x1xf32, #tpu.memory_space<vmem>>, vector<1x8x1xf32>
    %104 = vector.shape_cast %103 : vector<1x8x1xf32> to vector<8x1xf32>
    %105 = arith.mulf %99, %104 : vector<8x1xf32>
    %cst_86 = arith.constant dense<0.000000e+00> : vector<8xf32>
    %106 = vector.multi_reduction <add>, %102, %cst_86 [1] : vector<8x8xf32> to vector<8xf32>
    %107 = vector.shape_cast %106 : vector<8xf32> to vector<8x1xf32>
    %108 = arith.addf %105, %107 : vector<8x1xf32>
    %c2_87 = arith.constant 2 : index
    %c0_88 = arith.constant 0 : index
    %c0_89 = arith.constant 0 : index
    %109 = vector.load %arg14[%c2_87, %c0_88, %c0_89] : memref<4x8x1xf32, #tpu.memory_space<vmem>>, vector<1x8x1xf32>
    %110 = vector.shape_cast %109 : vector<1x8x1xf32> to vector<8x1xf32>
    %111 = vector.shape_cast %108 : vector<8x1xf32> to vector<1x8x1xf32>
    tpu.vector_store %arg14[%c2_87, %c0_88, %c0_89], %111 {strides = array<i32>} : memref<4x8x1xf32, #tpu.memory_space<vmem>>, vector<1x8x1xf32>,
    %c0_90 = arith.constant 0 : index
    %c16 = arith.constant 16 : index
    %112 = vector.load %arg15[%c0_90, %c16] : memref<8x32xf32, #tpu.memory_space<vmem>>, vector<8x8xf32>
    %113 = vector.broadcast %99 : vector<8x1xf32> to vector<8x8xf32>
    %114 = arith.mulf %113, %112 : vector<8x8xf32>
    %115 = arith.truncf %102 : vector<8x8xf32> to vector<8x8xbf16>
    %cst_91 = arith.constant dense<0.000000e+00> : vector<8x8xf32>
    %116 = tpu.matmul %115, %89, %cst_91 {dimension_numbers = #tpu.dot_dimension_numbers<[1], [0], [0], [1], [0, 0, 1, 1], [], []>} : vector<8x8xbf16>, vector<8x8xbf16>, vector<8x8xf32> -> vector<8x8xf32>
    %117 = arith.addf %114, %116 : vector<8x8xf32>
    %c0_92 = arith.constant 0 : index
    %c16_93 = arith.constant 16 : index
    %118 = vector.load %arg15[%c0_92, %c16_93] : memref<8x32xf32, #tpu.memory_space<vmem>>, vector<8x8xf32>
    tpu.vector_store %arg15[%c0_92, %c16_93], %117 {strides = array<i32>} : memref<8x32xf32, #tpu.memory_space<vmem>>, vector<8x8xf32>,
    %c2_94 = arith.constant 2 : index
    %c0_95 = arith.constant 0 : index
    %c0_96 = arith.constant 0 : index
    %119 = vector.load %arg13[%c2_94, %c0_95, %c0_96] : memref<4x8x1xf32, #tpu.memory_space<vmem>>, vector<1x8x1xf32>
    %120 = vector.shape_cast %119 : vector<1x8x1xf32> to vector<8x1xf32>
    %121 = vector.shape_cast %97 : vector<8x1xf32> to vector<1x8x1xf32>
    tpu.vector_store %arg13[%c2_94, %c0_95, %c0_96], %121 {strides = array<i32>} : memref<4x8x1xf32, #tpu.memory_space<vmem>>, vector<1x8x1xf32>,
    %c0_97 = arith.constant 0 : index
    %c3 = arith.constant 3 : index
    %c0_98 = arith.constant 0 : index
    %c0_99 = arith.constant 0 : index
    %122 = vector.load %arg4[%c0_97, %c3, %c0_98, %c0_99] : memref<1x4x8x8xbf16, #tpu.memory_space<vmem>>, vector<1x1x8x8xbf16>
    %123 = vector.shape_cast %122 : vector<1x1x8x8xbf16> to vector<8x8xbf16>
    %c0_100 = arith.constant 0 : index
    %c3_101 = arith.constant 3 : index
    %c0_102 = arith.constant 0 : index
    %c0_103 = arith.constant 0 : index
    %124 = vector.load %arg5[%c0_100, %c3_101, %c0_102, %c0_103] : memref<1x4x8x8xbf16, #tpu.memory_space<vmem>>, vector<1x1x8x8xbf16>
    %125 = vector.shape_cast %124 : vector<1x1x8x8xbf16> to vector<8x8xbf16>
    %c0_104 = arith.constant 0 : index
    %c3_105 = arith.constant 3 : index
    %c0_106 = arith.constant 0 : index
    %c0_107 = arith.constant 0 : index
    %126 = vector.load %arg6[%c0_104, %c3_105, %c0_106, %c0_107] : memref<1x4x8x8xbf16, #tpu.memory_space<vmem>>, vector<1x1x8x8xbf16>
    %127 = vector.shape_cast %126 : vector<1x1x8x8xbf16> to vector<8x8xbf16>
    %cst_108 = arith.constant dense<0.000000e+00> : vector<8x8xf32>
    %128 = tpu.matmul %123, %125, %cst_108 {dimension_numbers = #tpu.dot_dimension_numbers<[1], [1], [0], [0], [0, 0, 1, 0], [], []>} : vector<8x8xbf16>, vector<8x8xbf16>, vector<8x8xf32> -> vector<8x8xf32>
    %cst_109 = arith.constant 0.353553385 : f32
    %129 = vector.broadcast %cst_109 : f32 to vector<8x8xf32>
    %130 = arith.mulf %128, %129 : vector<8x8xf32>
    %c3_110 = arith.constant 3 : index
    %c0_111 = arith.constant 0 : index
    %c0_112 = arith.constant 0 : index
    %131 = vector.load %arg13[%c3_110, %c0_111, %c0_112] : memref<4x8x1xf32, #tpu.memory_space<vmem>>, vector<1x8x1xf32>
    %132 = vector.shape_cast %131 : vector<1x8x1xf32> to vector<8x1xf32>
    %cst_113 = arith.constant dense<0xFF800000> : vector<8xf32>
    %133 = vector.multi_reduction <maximumf>, %130, %cst_113 [1] : vector<8x8xf32> to vector<8xf32>
    %134 = vector.shape_cast %133 : vector<8xf32> to vector<8x1xf32>
    %135 = arith.maximumf %132, %134 : vector<8x1xf32>
    %136 = arith.subf %132, %135 : vector<8x1xf32>
    %137 = math.exp %136 : vector<8x1xf32>
    %138 = vector.broadcast %135 : vector<8x1xf32> to vector<8x8xf32>
    %139 = arith.subf %130, %138 : vector<8x8xf32>
    %140 = math.exp %139 : vector<8x8xf32>
    %c3_114 = arith.constant 3 : index
    %c0_115 = arith.constant 0 : index
    %c0_116 = arith.constant 0 : index
    %141 = vector.load %arg14[%c3_114, %c0_115, %c0_116] : memref<4x8x1xf32, #tpu.memory_space<vmem>>, vector<1x8x1xf32>
    %142 = vector.shape_cast %141 : vector<1x8x1xf32> to vector<8x1xf32>
    %143 = arith.mulf %137, %142 : vector<8x1xf32>
    %cst_117 = arith.constant dense<0.000000e+00> : vector<8xf32>
    %144 = vector.multi_reduction <add>, %140, %cst_117 [1] : vector<8x8xf32> to vector<8xf32>
    %145 = vector.shape_cast %144 : vector<8xf32> to vector<8x1xf32>
    %146 = arith.addf %143, %145 : vector<8x1xf32>
    %c3_118 = arith.constant 3 : index
    %c0_119 = arith.constant 0 : index
    %c0_120 = arith.constant 0 : index
    %147 = vector.load %arg14[%c3_118, %c0_119, %c0_120] : memref<4x8x1xf32, #tpu.memory_space<vmem>>, vector<1x8x1xf32>
    %148 = vector.shape_cast %147 : vector<1x8x1xf32> to vector<8x1xf32>
    %149 = vector.shape_cast %146 : vector<8x1xf32> to vector<1x8x1xf32>
    tpu.vector_store %arg14[%c3_118, %c0_119, %c0_120], %149 {strides = array<i32>} : memref<4x8x1xf32, #tpu.memory_space<vmem>>, vector<1x8x1xf32>,
    %c0_121 = arith.constant 0 : index
    %c24 = arith.constant 24 : index
    %150 = vector.load %arg15[%c0_121, %c24] : memref<8x32xf32, #tpu.memory_space<vmem>>, vector<8x8xf32>
    %151 = vector.broadcast %137 : vector<8x1xf32> to vector<8x8xf32>
    %152 = arith.mulf %151, %150 : vector<8x8xf32>
    %153 = arith.truncf %140 : vector<8x8xf32> to vector<8x8xbf16>
    %cst_122 = arith.constant dense<0.000000e+00> : vector<8x8xf32>
    %154 = tpu.matmul %153, %127, %cst_122 {dimension_numbers = #tpu.dot_dimension_numbers<[1], [0], [0], [1], [0, 0, 1, 1], [], []>} : vector<8x8xbf16>, vector<8x8xbf16>, vector<8x8xf32> -> vector<8x8xf32>
    %155 = arith.addf %152, %154 : vector<8x8xf32>
    %c0_123 = arith.constant 0 : index
    %c24_124 = arith.constant 24 : index
    %156 = vector.load %arg15[%c0_123, %c24_124] : memref<8x32xf32, #tpu.memory_space<vmem>>, vector<8x8xf32>
    tpu.vector_store %arg15[%c0_123, %c24_124], %155 {strides = array<i32>} : memref<8x32xf32, #tpu.memory_space<vmem>>, vector<8x8xf32>,
    %c3_125 = arith.constant 3 : index
    %c0_126 = arith.constant 0 : index
    %c0_127 = arith.constant 0 : index
    %157 = vector.load %arg13[%c3_125, %c0_126, %c0_127] : memref<4x8x1xf32, #tpu.memory_space<vmem>>, vector<1x8x1xf32>
    %158 = vector.shape_cast %157 : vector<1x8x1xf32> to vector<8x1xf32>
    %159 = vector.shape_cast %135 : vector<8x1xf32> to vector<1x8x1xf32>
    tpu.vector_store %arg13[%c3_125, %c0_126, %c0_127], %159 {strides = array<i32>} : memref<4x8x1xf32, #tpu.memory_space<vmem>>, vector<1x8x1xf32>,
    %c0_i32_128 = arith.constant 0 : i32
    %160 = arith.cmpi eq, %arg3, %c0_i32_128 : i32
    %161 = arith.extui %160 : i1 to i32
    %c0_i32_129 = arith.constant 0 : i32
    %162 = arith.cmpi ne, %161, %c0_i32_129 : i32
    scf.if %162 {
      %c0_133 = arith.constant 0 : index
      %c0_134 = arith.constant 0 : index
      %168 = vector.load %arg15[%c0_133, %c0_134] : memref<8x32xf32, #tpu.memory_space<vmem>>, vector<8x8xf32>
      %c0_135 = arith.constant 0 : index
      %c0_136 = arith.constant 0 : index
      %c0_137 = arith.constant 0 : index
      %169 = vector.load %arg14[%c0_135, %c0_136, %c0_137] : memref<4x8x1xf32, #tpu.memory_space<vmem>>, vector<1x8x1xf32>
      %170 = vector.shape_cast %169 : vector<1x8x1xf32> to vector<8x1xf32>
      %171 = vector.broadcast %170 : vector<8x1xf32> to vector<8x8xf32>
      %172 = arith.divf %168, %171 : vector<8x8xf32>
      %c0_138 = arith.constant 0 : index
      %c0_139 = arith.constant 0 : index
      %173 = vector.load %arg15[%c0_138, %c0_139] : memref<8x32xf32, #tpu.memory_space<vmem>>, vector<8x8xf32>
      tpu.vector_store %arg15[%c0_138, %c0_139], %172 {strides = array<i32>} : memref<8x32xf32, #tpu.memory_space<vmem>>, vector<8x8xf32>,
      %c0_140 = arith.constant 0 : index
      %c8_141 = arith.constant 8 : index
      %174 = vector.load %arg15[%c0_140, %c8_141] : memref<8x32xf32, #tpu.memory_space<vmem>>, vector<8x8xf32>
      %c1_142 = arith.constant 1 : index
      %c0_143 = arith.constant 0 : index
      %c0_144 = arith.constant 0 : index
      %175 = vector.load %arg14[%c1_142, %c0_143, %c0_144] : memref<4x8x1xf32, #tpu.memory_space<vmem>>, vector<1x8x1xf32>
      %176 = vector.shape_cast %175 : vector<1x8x1xf32> to vector<8x1xf32>
      %177 = vector.broadcast %176 : vector<8x1xf32> to vector<8x8xf32>
      %178 = arith.divf %174, %177 : vector<8x8xf32>
      %c0_145 = arith.constant 0 : index
      %c8_146 = arith.constant 8 : index
      %179 = vector.load %arg15[%c0_145, %c8_146] : memref<8x32xf32, #tpu.memory_space<vmem>>, vector<8x8xf32>
      tpu.vector_store %arg15[%c0_145, %c8_146], %178 {strides = array<i32>} : memref<8x32xf32, #tpu.memory_space<vmem>>, vector<8x8xf32>,
      %c0_147 = arith.constant 0 : index
      %c16_148 = arith.constant 16 : index
      %180 = vector.load %arg15[%c0_147, %c16_148] : memref<8x32xf32, #tpu.memory_space<vmem>>, vector<8x8xf32>
      %c2_149 = arith.constant 2 : index
      %c0_150 = arith.constant 0 : index
      %c0_151 = arith.constant 0 : index
      %181 = vector.load %arg14[%c2_149, %c0_150, %c0_151] : memref<4x8x1xf32, #tpu.memory_space<vmem>>, vector<1x8x1xf32>
      %182 = vector.shape_cast %181 : vector<1x8x1xf32> to vector<8x1xf32>
      %183 = vector.broadcast %182 : vector<8x1xf32> to vector<8x8xf32>
      %184 = arith.divf %180, %183 : vector<8x8xf32>
      %c0_152 = arith.constant 0 : index
      %c16_153 = arith.constant 16 : index
      %185 = vector.load %arg15[%c0_152, %c16_153] : memref<8x32xf32, #tpu.memory_space<vmem>>, vector<8x8xf32>
      tpu.vector_store %arg15[%c0_152, %c16_153], %184 {strides = array<i32>} : memref<8x32xf32, #tpu.memory_space<vmem>>, vector<8x8xf32>,
      %c0_154 = arith.constant 0 : index
      %c24_155 = arith.constant 24 : index
      %186 = vector.load %arg15[%c0_154, %c24_155] : memref<8x32xf32, #tpu.memory_space<vmem>>, vector<8x8xf32>
      %c3_156 = arith.constant 3 : index
      %c0_157 = arith.constant 0 : index
      %c0_158 = arith.constant 0 : index
      %187 = vector.load %arg14[%c3_156, %c0_157, %c0_158] : memref<4x8x1xf32, #tpu.memory_space<vmem>>, vector<1x8x1xf32>
      %188 = vector.shape_cast %187 : vector<1x8x1xf32> to vector<8x1xf32>
      %189 = vector.broadcast %188 : vector<8x1xf32> to vector<8x8xf32>
      %190 = arith.divf %186, %189 : vector<8x8xf32>
      %c0_159 = arith.constant 0 : index
      %c24_160 = arith.constant 24 : index
      %191 = vector.load %arg15[%c0_159, %c24_160] : memref<8x32xf32, #tpu.memory_space<vmem>>, vector<8x8xf32>
      tpu.vector_store %arg15[%c0_159, %c24_160], %190 {strides = array<i32>} : memref<8x32xf32, #tpu.memory_space<vmem>>, vector<8x8xf32>,
      %c0_161 = arith.constant 0 : index
      %c0_162 = arith.constant 0 : index
      %192 = vector.load %arg16[%c0_161, %c0_162] : memref<8x32xf32, #tpu.memory_space<vmem>>, vector<8x32xf32>
      %c0_163 = arith.constant 0 : index
      %c0_164 = arith.constant 0 : index
      %193 = vector.load %arg15[%c0_163, %c0_164] : memref<8x32xf32, #tpu.memory_space<vmem>>, vector<8x32xf32>
      %194 = arith.truncf %193 : vector<8x32xf32> to vector<8x32xbf16>
      %c0_165 = arith.constant 0 : index
      %c0_166 = arith.constant 0 : index
      %195 = vector.load %arg8[%c0_165, %c0_166] : memref<32x32xbf16, #tpu.memory_space<vmem>>, vector<32x32xbf16>
      %cst_167 = arith.constant dense<0.000000e+00> : vector<8x32xf32>
      %196 = tpu.matmul %194, %195, %cst_167 {dimension_numbers = #tpu.dot_dimension_numbers<[1], [0], [0], [1], [0, 0, 1, 1], [], []>} : vector<8x32xbf16>, vector<32x32xbf16>, vector<8x32xf32> -> vector<8x32xf32>
      %197 = arith.addf %192, %196 : vector<8x32xf32>
      %c0_168 = arith.constant 0 : index
      %c0_169 = arith.constant 0 : index
      %198 = vector.load %arg16[%c0_168, %c0_169] : memref<8x32xf32, #tpu.memory_space<vmem>>, vector<8x32xf32>
      tpu.vector_store %arg16[%c0_168, %c0_169], %197 {strides = array<i32>} : memref<8x32xf32, #tpu.memory_space<vmem>>, vector<8x32xf32>,
    } else {
    }
    %c0_i32_130 = arith.constant 0 : i32
    %163 = arith.cmpi eq, %arg2, %c0_i32_130 : i32
    %c0_i32_131 = arith.constant 0 : i32
    %164 = arith.cmpi eq, %arg3, %c0_i32_131 : i32
    %165 = arith.andi %163, %164 : i1
    %166 = arith.extui %165 : i1 to i32
    %c0_i32_132 = arith.constant 0 : i32
    %167 = arith.cmpi ne, %166, %c0_i32_132 : i32
    scf.if %167 {
      %c0_133 = arith.constant 0 : index
      %c0_134 = arith.constant 0 : index
      %c0_135 = arith.constant 0 : index
      %168 = vector.load %arg7[%c0_133, %c0_134, %c0_135] : memref<1x8x32xf32, #tpu.memory_space<vmem>>, vector<1x8x32xf32>
      %169 = vector.shape_cast %168 : vector<1x8x32xf32> to vector<8x32xf32>
      %c0_136 = arith.constant 0 : index
      %c0_137 = arith.constant 0 : index
      %170 = vector.load %arg16[%c0_136, %c0_137] : memref<8x32xf32, #tpu.memory_space<vmem>>, vector<8x32xf32>
      %171 = arith.addf %169, %170 : vector<8x32xf32>
      %c0_138 = arith.constant 0 : index
      %c0_139 = arith.constant 0 : index
      %172 = vector.load %arg9[%c0_138, %c0_139] : memref<1x32xf32, #tpu.memory_space<vmem>>, vector<1x32xf32>
      %173 = vector.broadcast %172 : vector<1x32xf32> to vector<8x32xf32>
      %174 = arith.addf %171, %173 : vector<8x32xf32>
      %cst_140 = arith.constant dense<0.000000e+00> : vector<8xf32>
      %175 = vector.multi_reduction <add>, %174, %cst_140 [1] : vector<8x32xf32> to vector<8xf32>
      %176 = vector.shape_cast %175 : vector<8xf32> to vector<8x1xf32>
      %cst_141 = arith.constant 3.200000e+01 : f32
      %177 = vector.broadcast %cst_141 : f32 to vector<8x1xf32>
      %178 = arith.divf %176, %177 : vector<8x1xf32>
      %179 = vector.broadcast %178 : vector<8x1xf32> to vector<8x32xf32>
      %180 = arith.subf %174, %179 : vector<8x32xf32>
      %181 = arith.mulf %180, %180 : vector<8x32xf32>
      %cst_142 = arith.constant dense<0.000000e+00> : vector<8xf32>
      %182 = vector.multi_reduction <add>, %181, %cst_142 [1] : vector<8x32xf32> to vector<8xf32>
      %183 = vector.shape_cast %182 : vector<8xf32> to vector<8x1xf32>
      %cst_143 = arith.constant 3.200000e+01 : f32
      %184 = vector.broadcast %cst_143 : f32 to vector<8x1xf32>
      %185 = arith.divf %183, %184 : vector<8x1xf32>
      %186 = vector.broadcast %178 : vector<8x1xf32> to vector<8x32xf32>
      %187 = arith.subf %174, %186 : vector<8x32xf32>
      %cst_144 = arith.constant 9.99999974E-6 : f32
      %188 = vector.broadcast %cst_144 : f32 to vector<8x1xf32>
      %189 = arith.addf %185, %188 : vector<8x1xf32>
      %190 = math.rsqrt %189 : vector<8x1xf32>
      %191 = vector.broadcast %190 : vector<8x1xf32> to vector<8x32xf32>
      %192 = arith.mulf %187, %191 : vector<8x32xf32>
      %c0_145 = arith.constant 0 : index
      %c0_146 = arith.constant 0 : index
      %193 = vector.load %arg10[%c0_145, %c0_146] : memref<1x32xf32, #tpu.memory_space<vmem>>, vector<1x32xf32>
      %194 = vector.broadcast %193 : vector<1x32xf32> to vector<8x32xf32>
      %195 = arith.mulf %192, %194 : vector<8x32xf32>
      %c0_147 = arith.constant 0 : index
      %c0_148 = arith.constant 0 : index
      %196 = vector.load %arg11[%c0_147, %c0_148] : memref<1x32xf32, #tpu.memory_space<vmem>>, vector<1x32xf32>
      %197 = vector.broadcast %196 : vector<1x32xf32> to vector<8x32xf32>
      %198 = arith.addf %195, %197 : vector<8x32xf32>
      %c0_149 = arith.constant 0 : index
      %c0_150 = arith.constant 0 : index
      %c0_151 = arith.constant 0 : index
      %199 = vector.load %arg12[%c0_149, %c0_150, %c0_151] : memref<1x8x32xf32, #tpu.memory_space<vmem>>, vector<1x8x32xf32>
      %200 = vector.shape_cast %199 : vector<1x8x32xf32> to vector<8x32xf32>
      %201 = vector.shape_cast %198 : vector<8x32xf32> to vector<1x8x32xf32>
      tpu.vector_store %arg12[%c0_149, %c0_150, %c0_151], %201 {strides = array<i32>} : memref<1x8x32xf32, #tpu.memory_space<vmem>>, vector<1x8x32xf32>,
    } else {
    }
    return
  }
  func.func @transform_0(%arg0: i32, %arg1: i32, %arg2: i32, %arg3: i32) -> (i32, i32, i32, i32) {
    %c0_i32 = arith.constant 0 : i32
    %c0_i32_0 = arith.constant 0 : i32
    return %arg0, %arg2, %arg1, %c0_i32 : i32, i32, i32, i32
  }
  func.func @transform_1(%arg0: i32, %arg1: i32, %arg2: i32, %arg3: i32) -> (i32, i32, i32, i32) {
    %c0_i32 = arith.constant 0 : i32
    %c0_i32_0 = arith.constant 0 : i32
    return %arg0, %arg2, %arg3, %c0_i32 : i32, i32, i32, i32
  }
  func.func @transform_2(%arg0: i32, %arg1: i32, %arg2: i32, %arg3: i32) -> (i32, i32, i32, i32) {
    %c0_i32 = arith.constant 0 : i32
    %c0_i32_0 = arith.constant 0 : i32
    return %arg0, %arg2, %arg3, %c0_i32 : i32, i32, i32, i32
  }
  func.func @transform_3(%arg0: i32, %arg1: i32, %arg2: i32, %arg3: i32) -> (i32, i32, i32) {
    %c0_i32 = arith.constant 0 : i32
    %c0_i32_0 = arith.constant 0 : i32
    return %arg0, %arg1, %c0_i32 : i32, i32, i32
  }
  func.func @transform_4(%arg0: i32, %arg1: i32, %arg2: i32, %arg3: i32) -> (i32, i32) {
    %c0_i32 = arith.constant 0 : i32
    %c0_i32_0 = arith.constant 0 : i32
    return %arg2, %c0_i32 : i32, i32
  }
  func.func @transform_5(%arg0: i32, %arg1: i32, %arg2: i32, %arg3: i32) -> (i32, i32) {
    %c0_i32 = arith.constant 0 : i32
    %c0_i32_0 = arith.constant 0 : i32
    %c0_i32_1 = arith.constant 0 : i32
    return %c0_i32, %c0_i32_0 : i32, i32
  }
  func.func @transform_6(%arg0: i32, %arg1: i32, %arg2: i32, %arg3: i32) -> (i32, i32) {
    %c0_i32 = arith.constant 0 : i32
    %c0_i32_0 = arith.constant 0 : i32
    %c0_i32_1 = arith.constant 0 : i32
    return %c0_i32, %c0_i32_0 : i32, i32
  }
  func.func @transform_7(%arg0: i32, %arg1: i32, %arg2: i32, %arg3: i32) -> (i32, i32) {
    %c0_i32 = arith.constant 0 : i32
    %c0_i32_0 = arith.constant 0 : i32
    %c0_i32_1 = arith.constant 0 : i32
    return %c0_i32, %c0_i32_0 : i32, i32
  }
  func.func @transform_8(%arg0: i32, %arg1: i32, %arg2: i32, %arg3: i32) -> (i32, i32, i32) {
    %c0_i32 = arith.constant 0 : i32
    %c0_i32_0 = arith.constant 0 : i32
    return %arg0, %arg1, %c0_i32 : i32, i32, i32
  }
}

module attributes {stable_mosaic.version = 11 : i64} {
  func.func @ffn_add_ln_kernel(%arg0: i32, %arg1: i32, %arg2: memref<16x32xf32, #tpu.memory_space<vmem>>, %arg3: memref<32x64xbf16, #tpu.memory_space<vmem>>, %arg4: memref<1x64xf32, #tpu.memory_space<vmem>>, %arg5: memref<64x32xbf16, #tpu.memory_space<vmem>>, %arg6: memref<1x32xf32, #tpu.memory_space<vmem>>, %arg7: memref<1x32xf32, #tpu.memory_space<vmem>>, %arg8: memref<1x32xf32, #tpu.memory_space<vmem>>, %arg9: memref<16x32xf32, #tpu.memory_space<vmem>>, %arg10: memref<16x32xf32, #tpu.memory_space<vmem>>) attributes {dimension_semantics = [#tpu.dimension_semantics<parallel>, #tpu.dimension_semantics<arbitrary>], iteration_bounds = array<i64: 1, 1>, scalar_prefetch = 0 : i64, scratch_operands = 1 : i64, tpu.core_type = #tpu.core_type<tc>, window_params = [{transform_indices = @transform_0, window_bounds = array<i64: 16, 32>}, {transform_indices = @transform_1, window_bounds = array<i64: 32, 64>}, {transform_indices = @transform_2, window_bounds = array<i64: 1, 64>}, {transform_indices = @transform_3, window_bounds = array<i64: 64, 32>}, {pipeline_mode = #tpu.pipeline_mode<synchronous>, transform_indices = @transform_4, window_bounds = array<i64: 1, 32>}, {pipeline_mode = #tpu.pipeline_mode<synchronous>, transform_indices = @transform_5, window_bounds = array<i64: 1, 32>}, {pipeline_mode = #tpu.pipeline_mode<synchronous>, transform_indices = @transform_6, window_bounds = array<i64: 1, 32>}, {transform_indices = @transform_7, window_bounds = array<i64: 16, 32>}]} {
    %c0_i32 = arith.constant 0 : i32
    %0 = arith.cmpi eq, %arg1, %c0_i32 : i32
    %1 = arith.extui %0 : i1 to i32
    %c0_i32_0 = arith.constant 0 : i32
    %2 = arith.cmpi ne, %1, %c0_i32_0 : i32
    scf.if %2 {
      %cst_16 = arith.constant 0.000000e+00 : f32
      %21 = vector.broadcast %cst_16 : f32 to vector<16x32xf32>
      %c0_17 = arith.constant 0 : index
      %c0_18 = arith.constant 0 : index
      %22 = vector.load %arg10[%c0_17, %c0_18] : memref<16x32xf32, #tpu.memory_space<vmem>>, vector<16x32xf32>
      tpu.vector_store %arg10[%c0_17, %c0_18], %21 {strides = array<i32>} : memref<16x32xf32, #tpu.memory_space<vmem>>, vector<16x32xf32>,
    } else {
    }
    %c0 = arith.constant 0 : index
    %c0_1 = arith.constant 0 : index
    %3 = vector.load %arg2[%c0, %c0_1] : memref<16x32xf32, #tpu.memory_space<vmem>>, vector<16x32xf32>
    %4 = arith.truncf %3 : vector<16x32xf32> to vector<16x32xbf16>
    %c0_2 = arith.constant 0 : index
    %c0_3 = arith.constant 0 : index
    %5 = vector.load %arg3[%c0_2, %c0_3] : memref<32x64xbf16, #tpu.memory_space<vmem>>, vector<32x64xbf16>
    %cst = arith.constant dense<0.000000e+00> : vector<16x64xf32>
    %6 = tpu.matmul %4, %5, %cst {dimension_numbers = #tpu.dot_dimension_numbers<[1], [0], [0], [1], [0, 0, 1, 1], [], []>} : vector<16x32xbf16>, vector<32x64xbf16>, vector<16x64xf32> -> vector<16x64xf32>
    %c0_4 = arith.constant 0 : index
    %c0_5 = arith.constant 0 : index
    %7 = vector.load %arg4[%c0_4, %c0_5] : memref<1x64xf32, #tpu.memory_space<vmem>>, vector<1x64xf32>
    %8 = vector.broadcast %7 : vector<1x64xf32> to vector<16x64xf32>
    %9 = arith.addf %6, %8 : vector<16x64xf32>
    %cst_6 = arith.constant 0.000000e+00 : f32
    %10 = vector.broadcast %cst_6 : f32 to vector<16x64xf32>
    %11 = arith.maximumf %9, %10 : vector<16x64xf32>
    %c0_7 = arith.constant 0 : index
    %c0_8 = arith.constant 0 : index
    %12 = vector.load %arg10[%c0_7, %c0_8] : memref<16x32xf32, #tpu.memory_space<vmem>>, vector<16x32xf32>
    %13 = arith.truncf %11 : vector<16x64xf32> to vector<16x64xbf16>
    %c0_9 = arith.constant 0 : index
    %c0_10 = arith.constant 0 : index
    %14 = vector.load %arg5[%c0_9, %c0_10] : memref<64x32xbf16, #tpu.memory_space<vmem>>, vector<64x32xbf16>
    %cst_11 = arith.constant dense<0.000000e+00> : vector<16x32xf32>
    %15 = tpu.matmul %13, %14, %cst_11 {dimension_numbers = #tpu.dot_dimension_numbers<[1], [0], [0], [1], [0, 0, 1, 1], [], []>} : vector<16x64xbf16>, vector<64x32xbf16>, vector<16x32xf32> -> vector<16x32xf32>
    %16 = arith.addf %12, %15 : vector<16x32xf32>
    %c0_12 = arith.constant 0 : index
    %c0_13 = arith.constant 0 : index
    %17 = vector.load %arg10[%c0_12, %c0_13] : memref<16x32xf32, #tpu.memory_space<vmem>>, vector<16x32xf32>
    tpu.vector_store %arg10[%c0_12, %c0_13], %16 {strides = array<i32>} : memref<16x32xf32, #tpu.memory_space<vmem>>, vector<16x32xf32>,
    %c0_i32_14 = arith.constant 0 : i32
    %18 = arith.cmpi eq, %arg1, %c0_i32_14 : i32
    %19 = arith.extui %18 : i1 to i32
    %c0_i32_15 = arith.constant 0 : i32
    %20 = arith.cmpi ne, %19, %c0_i32_15 : i32
    scf.if %20 {
      %c0_16 = arith.constant 0 : index
      %c0_17 = arith.constant 0 : index
      %21 = vector.load %arg2[%c0_16, %c0_17] : memref<16x32xf32, #tpu.memory_space<vmem>>, vector<16x32xf32>
      %c0_18 = arith.constant 0 : index
      %c0_19 = arith.constant 0 : index
      %22 = vector.load %arg10[%c0_18, %c0_19] : memref<16x32xf32, #tpu.memory_space<vmem>>, vector<16x32xf32>
      %23 = arith.addf %21, %22 : vector<16x32xf32>
      %c0_20 = arith.constant 0 : index
      %c0_21 = arith.constant 0 : index
      %24 = vector.load %arg6[%c0_20, %c0_21] : memref<1x32xf32, #tpu.memory_space<vmem>>, vector<1x32xf32>
      %25 = vector.broadcast %24 : vector<1x32xf32> to vector<16x32xf32>
      %26 = arith.addf %23, %25 : vector<16x32xf32>
      %cst_22 = arith.constant dense<0.000000e+00> : vector<16xf32>
      %27 = vector.multi_reduction <add>, %26, %cst_22 [1] : vector<16x32xf32> to vector<16xf32>
      %28 = vector.shape_cast %27 : vector<16xf32> to vector<16x1xf32>
      %cst_23 = arith.constant 3.200000e+01 : f32
      %29 = vector.broadcast %cst_23 : f32 to vector<16x1xf32>
      %30 = arith.divf %28, %29 : vector<16x1xf32>
      %31 = vector.broadcast %30 : vector<16x1xf32> to vector<16x32xf32>
      %32 = arith.subf %26, %31 : vector<16x32xf32>
      %33 = arith.mulf %32, %32 : vector<16x32xf32>
      %cst_24 = arith.constant dense<0.000000e+00> : vector<16xf32>
      %34 = vector.multi_reduction <add>, %33, %cst_24 [1] : vector<16x32xf32> to vector<16xf32>
      %35 = vector.shape_cast %34 : vector<16xf32> to vector<16x1xf32>
      %cst_25 = arith.constant 3.200000e+01 : f32
      %36 = vector.broadcast %cst_25 : f32 to vector<16x1xf32>
      %37 = arith.divf %35, %36 : vector<16x1xf32>
      %38 = vector.broadcast %30 : vector<16x1xf32> to vector<16x32xf32>
      %39 = arith.subf %26, %38 : vector<16x32xf32>
      %cst_26 = arith.constant 9.99999974E-6 : f32
      %40 = vector.broadcast %cst_26 : f32 to vector<16x1xf32>
      %41 = arith.addf %37, %40 : vector<16x1xf32>
      %42 = math.rsqrt %41 : vector<16x1xf32>
      %43 = vector.broadcast %42 : vector<16x1xf32> to vector<16x32xf32>
      %44 = arith.mulf %39, %43 : vector<16x32xf32>
      %c0_27 = arith.constant 0 : index
      %c0_28 = arith.constant 0 : index
      %45 = vector.load %arg7[%c0_27, %c0_28] : memref<1x32xf32, #tpu.memory_space<vmem>>, vector<1x32xf32>
      %46 = vector.broadcast %45 : vector<1x32xf32> to vector<16x32xf32>
      %47 = arith.mulf %44, %46 : vector<16x32xf32>
      %c0_29 = arith.constant 0 : index
      %c0_30 = arith.constant 0 : index
      %48 = vector.load %arg8[%c0_29, %c0_30] : memref<1x32xf32, #tpu.memory_space<vmem>>, vector<1x32xf32>
      %49 = vector.broadcast %48 : vector<1x32xf32> to vector<16x32xf32>
      %50 = arith.addf %47, %49 : vector<16x32xf32>
      %c0_31 = arith.constant 0 : index
      %c0_32 = arith.constant 0 : index
      %51 = vector.load %arg9[%c0_31, %c0_32] : memref<16x32xf32, #tpu.memory_space<vmem>>, vector<16x32xf32>
      tpu.vector_store %arg9[%c0_31, %c0_32], %50 {strides = array<i32>} : memref<16x32xf32, #tpu.memory_space<vmem>>, vector<16x32xf32>,
    } else {
    }
    return
  }
  func.func @transform_0(%arg0: i32, %arg1: i32) -> (i32, i32) {
    %c0_i32 = arith.constant 0 : i32
    %c0_i32_0 = arith.constant 0 : i32
    return %arg0, %c0_i32 : i32, i32
  }
  func.func @transform_1(%arg0: i32, %arg1: i32) -> (i32, i32) {
    %c0_i32 = arith.constant 0 : i32
    %c0_i32_0 = arith.constant 0 : i32
    return %c0_i32, %arg1 : i32, i32
  }
  func.func @transform_2(%arg0: i32, %arg1: i32) -> (i32, i32) {
    %c0_i32 = arith.constant 0 : i32
    %c0_i32_0 = arith.constant 0 : i32
    return %c0_i32, %arg1 : i32, i32
  }
  func.func @transform_3(%arg0: i32, %arg1: i32) -> (i32, i32) {
    %c0_i32 = arith.constant 0 : i32
    %c0_i32_0 = arith.constant 0 : i32
    return %arg1, %c0_i32 : i32, i32
  }
  func.func @transform_4(%arg0: i32, %arg1: i32) -> (i32, i32) {
    %c0_i32 = arith.constant 0 : i32
    %c0_i32_0 = arith.constant 0 : i32
    %c0_i32_1 = arith.constant 0 : i32
    return %c0_i32, %c0_i32_0 : i32, i32
  }
  func.func @transform_5(%arg0: i32, %arg1: i32) -> (i32, i32) {
    %c0_i32 = arith.constant 0 : i32
    %c0_i32_0 = arith.constant 0 : i32
    %c0_i32_1 = arith.constant 0 : i32
    return %c0_i32, %c0_i32_0 : i32, i32
  }
  func.func @transform_6(%arg0: i32, %arg1: i32) -> (i32, i32) {
    %c0_i32 = arith.constant 0 : i32
    %c0_i32_0 = arith.constant 0 : i32
    %c0_i32_1 = arith.constant 0 : i32
    return %c0_i32, %c0_i32_0 : i32, i32
  }
  func.func @transform_7(%arg0: i32, %arg1: i32) -> (i32, i32) {
    %c0_i32 = arith.constant 0 : i32
    %c0_i32_0 = arith.constant 0 : i32
    return %arg0, %c0_i32 : i32, i32
  }
}

module attributes {stable_mosaic.version = 11 : i64} {
  func.func @linear_kernel(%arg0: i32, %arg1: memref<16x32xf32, #tpu.memory_space<vmem>>, %arg2: memref<32x64xbf16, #tpu.memory_space<vmem>>, %arg3: memref<1x64xf32, #tpu.memory_space<vmem>>, %arg4: memref<16x64xbf16, #tpu.memory_space<vmem>>) attributes {dimension_semantics = [#tpu.dimension_semantics<parallel>], iteration_bounds = array<i64: 1>, scalar_prefetch = 0 : i64, scratch_operands = 0 : i64, tpu.core_type = #tpu.core_type<tc>, window_params = [{transform_indices = @transform_0, window_bounds = array<i64: 16, 32>}, {pipeline_mode = #tpu.pipeline_mode<synchronous>, transform_indices = @transform_1, window_bounds = array<i64: 32, 64>}, {pipeline_mode = #tpu.pipeline_mode<synchronous>, transform_indices = @transform_2, window_bounds = array<i64: 1, 64>}, {transform_indices = @transform_3, window_bounds = array<i64: 16, 64>}]} {
    %c0 = arith.constant 0 : index
    %c0_0 = arith.constant 0 : index
    %0 = vector.load %arg1[%c0, %c0_0] : memref<16x32xf32, #tpu.memory_space<vmem>>, vector<16x32xf32>
    %1 = arith.truncf %0 : vector<16x32xf32> to vector<16x32xbf16>
    %c0_1 = arith.constant 0 : index
    %c0_2 = arith.constant 0 : index
    %2 = vector.load %arg2[%c0_1, %c0_2] : memref<32x64xbf16, #tpu.memory_space<vmem>>, vector<32x64xbf16>
    %cst = arith.constant dense<0.000000e+00> : vector<16x64xf32>
    %3 = tpu.matmul %1, %2, %cst {dimension_numbers = #tpu.dot_dimension_numbers<[1], [0], [0], [1], [0, 0, 1, 1], [], []>} : vector<16x32xbf16>, vector<32x64xbf16>, vector<16x64xf32> -> vector<16x64xf32>
    %c0_3 = arith.constant 0 : index
    %c0_4 = arith.constant 0 : index
    %4 = vector.load %arg3[%c0_3, %c0_4] : memref<1x64xf32, #tpu.memory_space<vmem>>, vector<1x64xf32>
    %5 = vector.broadcast %4 : vector<1x64xf32> to vector<16x64xf32>
    %6 = arith.addf %3, %5 : vector<16x64xf32>
    %7 = arith.truncf %6 : vector<16x64xf32> to vector<16x64xbf16>
    %c0_5 = arith.constant 0 : index
    %c0_6 = arith.constant 0 : index
    %8 = vector.load %arg4[%c0_5, %c0_6] : memref<16x64xbf16, #tpu.memory_space<vmem>>, vector<16x64xbf16>
    tpu.vector_store %arg4[%c0_5, %c0_6], %7 {strides = array<i32>} : memref<16x64xbf16, #tpu.memory_space<vmem>>, vector<16x64xbf16>,
    return
  }
  func.func @transform_0(%arg0: i32) -> (i32, i32) {
    %c0_i32 = arith.constant 0 : i32
    %c0_i32_0 = arith.constant 0 : i32
    return %arg0, %c0_i32 : i32, i32
  }
  func.func @transform_1(%arg0: i32) -> (i32, i32) {
    %c0_i32 = arith.constant 0 : i32
    %c0_i32_0 = arith.constant 0 : i32
    %c0_i32_1 = arith.constant 0 : i32
    return %c0_i32, %c0_i32_0 : i32, i32
  }
  func.func @transform_2(%arg0: i32) -> (i32, i32) {
    %c0_i32 = arith.constant 0 : i32
    %c0_i32_0 = arith.constant 0 : i32
    %c0_i32_1 = arith.constant 0 : i32
    return %c0_i32, %c0_i32_0 : i32, i32
  }
  func.func @transform_3(%arg0: i32) -> (i32, i32) {
    %c0_i32 = arith.constant 0 : i32
    %c0_i32_0 = arith.constant 0 : i32
    return %arg0, %c0_i32 : i32, i32
  }
}

module attributes {stable_mosaic.version = 11 : i64} {
  func.func @ffn_add_ln_kernel(%arg0: i32, %arg1: i32, %arg2: memref<16x32xf32, #tpu.memory_space<vmem>>, %arg3: memref<32x64xbf16, #tpu.memory_space<vmem>>, %arg4: memref<1x64xf32, #tpu.memory_space<vmem>>, %arg5: memref<64x32xbf16, #tpu.memory_space<vmem>>, %arg6: memref<1x32xf32, #tpu.memory_space<vmem>>, %arg7: memref<1x32xf32, #tpu.memory_space<vmem>>, %arg8: memref<1x32xf32, #tpu.memory_space<vmem>>, %arg9: memref<16x32xf32, #tpu.memory_space<vmem>>, %arg10: memref<16x32xf32, #tpu.memory_space<vmem>>) attributes {dimension_semantics = [#tpu.dimension_semantics<parallel>, #tpu.dimension_semantics<arbitrary>], iteration_bounds = array<i64: 1, 1>, scalar_prefetch = 0 : i64, scratch_operands = 1 : i64, tpu.core_type = #tpu.core_type<tc>, window_params = [{transform_indices = @transform_0, window_bounds = array<i64: 16, 32>}, {transform_indices = @transform_1, window_bounds = array<i64: 32, 64>}, {transform_indices = @transform_2, window_bounds = array<i64: 1, 64>}, {transform_indices = @transform_3, window_bounds = array<i64: 64, 32>}, {pipeline_mode = #tpu.pipeline_mode<synchronous>, transform_indices = @transform_4, window_bounds = array<i64: 1, 32>}, {pipeline_mode = #tpu.pipeline_mode<synchronous>, transform_indices = @transform_5, window_bounds = array<i64: 1, 32>}, {pipeline_mode = #tpu.pipeline_mode<synchronous>, transform_indices = @transform_6, window_bounds = array<i64: 1, 32>}, {transform_indices = @transform_7, window_bounds = array<i64: 16, 32>}]} {
    %c0_i32 = arith.constant 0 : i32
    %0 = arith.cmpi eq, %arg1, %c0_i32 : i32
    %1 = arith.extui %0 : i1 to i32
    %c0_i32_0 = arith.constant 0 : i32
    %2 = arith.cmpi ne, %1, %c0_i32_0 : i32
    scf.if %2 {
      %cst_16 = arith.constant 0.000000e+00 : f32
      %21 = vector.broadcast %cst_16 : f32 to vector<16x32xf32>
      %c0_17 = arith.constant 0 : index
      %c0_18 = arith.constant 0 : index
      %22 = vector.load %arg10[%c0_17, %c0_18] : memref<16x32xf32, #tpu.memory_space<vmem>>, vector<16x32xf32>
      tpu.vector_store %arg10[%c0_17, %c0_18], %21 {strides = array<i32>} : memref<16x32xf32, #tpu.memory_space<vmem>>, vector<16x32xf32>,
    } else {
    }
    %c0 = arith.constant 0 : index
    %c0_1 = arith.constant 0 : index
    %3 = vector.load %arg2[%c0, %c0_1] : memref<16x32xf32, #tpu.memory_space<vmem>>, vector<16x32xf32>
    %4 = arith.truncf %3 : vector<16x32xf32> to vector<16x32xbf16>
    %c0_2 = arith.constant 0 : index
    %c0_3 = arith.constant 0 : index
    %5 = vector.load %arg3[%c0_2, %c0_3] : memref<32x64xbf16, #tpu.memory_space<vmem>>, vector<32x64xbf16>
    %cst = arith.constant dense<0.000000e+00> : vector<16x64xf32>
    %6 = tpu.matmul %4, %5, %cst {dimension_numbers = #tpu.dot_dimension_numbers<[1], [0], [0], [1], [0, 0, 1, 1], [], []>} : vector<16x32xbf16>, vector<32x64xbf16>, vector<16x64xf32> -> vector<16x64xf32>
    %c0_4 = arith.constant 0 : index
    %c0_5 = arith.constant 0 : index
    %7 = vector.load %arg4[%c0_4, %c0_5] : memref<1x64xf32, #tpu.memory_space<vmem>>, vector<1x64xf32>
    %8 = vector.broadcast %7 : vector<1x64xf32> to vector<16x64xf32>
    %9 = arith.addf %6, %8 : vector<16x64xf32>
    %cst_6 = arith.constant 0.000000e+00 : f32
    %10 = vector.broadcast %cst_6 : f32 to vector<16x64xf32>
    %11 = arith.maximumf %9, %10 : vector<16x64xf32>
    %c0_7 = arith.constant 0 : index
    %c0_8 = arith.constant 0 : index
    %12 = vector.load %arg10[%c0_7, %c0_8] : memref<16x32xf32, #tpu.memory_space<vmem>>, vector<16x32xf32>
    %13 = arith.truncf %11 : vector<16x64xf32> to vector<16x64xbf16>
    %c0_9 = arith.constant 0 : index
    %c0_10 = arith.constant 0 : index
    %14 = vector.load %arg5[%c0_9, %c0_10] : memref<64x32xbf16, #tpu.memory_space<vmem>>, vector<64x32xbf16>
    %cst_11 = arith.constant dense<0.000000e+00> : vector<16x32xf32>
    %15 = tpu.matmul %13, %14, %cst_11 {dimension_numbers = #tpu.dot_dimension_numbers<[1], [0], [0], [1], [0, 0, 1, 1], [], []>} : vector<16x64xbf16>, vector<64x32xbf16>, vector<16x32xf32> -> vector<16x32xf32>
    %16 = arith.addf %12, %15 : vector<16x32xf32>
    %c0_12 = arith.constant 0 : index
    %c0_13 = arith.constant 0 : index
    %17 = vector.load %arg10[%c0_12, %c0_13] : memref<16x32xf32, #tpu.memory_space<vmem>>, vector<16x32xf32>
    tpu.vector_store %arg10[%c0_12, %c0_13], %16 {strides = array<i32>} : memref<16x32xf32, #tpu.memory_space<vmem>>, vector<16x32xf32>,
    %c0_i32_14 = arith.constant 0 : i32
    %18 = arith.cmpi eq, %arg1, %c0_i32_14 : i32
    %19 = arith.extui %18 : i1 to i32
    %c0_i32_15 = arith.constant 0 : i32
    %20 = arith.cmpi ne, %19, %c0_i32_15 : i32
    scf.if %20 {
      %c0_16 = arith.constant 0 : index
      %c0_17 = arith.constant 0 : index
      %21 = vector.load %arg2[%c0_16, %c0_17] : memref<16x32xf32, #tpu.memory_space<vmem>>, vector<16x32xf32>
      %c0_18 = arith.constant 0 : index
      %c0_19 = arith.constant 0 : index
      %22 = vector.load %arg10[%c0_18, %c0_19] : memref<16x32xf32, #tpu.memory_space<vmem>>, vector<16x32xf32>
      %23 = arith.addf %21, %22 : vector<16x32xf32>
      %c0_20 = arith.constant 0 : index
      %c0_21 = arith.constant 0 : index
      %24 = vector.load %arg6[%c0_20, %c0_21] : memref<1x32xf32, #tpu.memory_space<vmem>>, vector<1x32xf32>
      %25 = vector.broadcast %24 : vector<1x32xf32> to vector<16x32xf32>
      %26 = arith.addf %23, %25 : vector<16x32xf32>
      %cst_22 = arith.constant dense<0.000000e+00> : vector<16xf32>
      %27 = vector.multi_reduction <add>, %26, %cst_22 [1] : vector<16x32xf32> to vector<16xf32>
      %28 = vector.shape_cast %27 : vector<16xf32> to vector<16x1xf32>
      %cst_23 = arith.constant 3.200000e+01 : f32
      %29 = vector.broadcast %cst_23 : f32 to vector<16x1xf32>
      %30 = arith.divf %28, %29 : vector<16x1xf32>
      %31 = vector.broadcast %30 : vector<16x1xf32> to vector<16x32xf32>
      %32 = arith.subf %26, %31 : vector<16x32xf32>
      %33 = arith.mulf %32, %32 : vector<16x32xf32>
      %cst_24 = arith.constant dense<0.000000e+00> : vector<16xf32>
      %34 = vector.multi_reduction <add>, %33, %cst_24 [1] : vector<16x32xf32> to vector<16xf32>
      %35 = vector.shape_cast %34 : vector<16xf32> to vector<16x1xf32>
      %cst_25 = arith.constant 3.200000e+01 : f32
      %36 = vector.broadcast %cst_25 : f32 to vector<16x1xf32>
      %37 = arith.divf %35, %36 : vector<16x1xf32>
      %38 = vector.broadcast %30 : vector<16x1xf32> to vector<16x32xf32>
      %39 = arith.subf %26, %38 : vector<16x32xf32>
      %cst_26 = arith.constant 9.99999974E-6 : f32
      %40 = vector.broadcast %cst_26 : f32 to vector<16x1xf32>
      %41 = arith.addf %37, %40 : vector<16x1xf32>
      %42 = math.rsqrt %41 : vector<16x1xf32>
      %43 = vector.broadcast %42 : vector<16x1xf32> to vector<16x32xf32>
      %44 = arith.mulf %39, %43 : vector<16x32xf32>
      %c0_27 = arith.constant 0 : index
      %c0_28 = arith.constant 0 : index
      %45 = vector.load %arg7[%c0_27, %c0_28] : memref<1x32xf32, #tpu.memory_space<vmem>>, vector<1x32xf32>
      %46 = vector.broadcast %45 : vector<1x32xf32> to vector<16x32xf32>
      %47 = arith.mulf %44, %46 : vector<16x32xf32>
      %c0_29 = arith.constant 0 : index
      %c0_30 = arith.constant 0 : index
      %48 = vector.load %arg8[%c0_29, %c0_30] : memref<1x32xf32, #tpu.memory_space<vmem>>, vector<1x32xf32>
      %49 = vector.broadcast %48 : vector<1x32xf32> to vector<16x32xf32>
      %50 = arith.addf %47, %49 : vector<16x32xf32>
      %c0_31 = arith.constant 0 : index
      %c0_32 = arith.constant 0 : index
      %51 = vector.load %arg9[%c0_31, %c0_32] : memref<16x32xf32, #tpu.memory_space<vmem>>, vector<16x32xf32>
      tpu.vector_store %arg9[%c0_31, %c0_32], %50 {strides = array<i32>} : memref<16x32xf32, #tpu.memory_space<vmem>>, vector<16x32xf32>,
    } else {
    }
    return
  }
  func.func @transform_0(%arg0: i32, %arg1: i32) -> (i32, i32) {
    %c0_i32 = arith.constant 0 : i32
    %c0_i32_0 = arith.constant 0 : i32
    return %arg0, %c0_i32 : i32, i32
  }
  func.func @transform_1(%arg0: i32, %arg1: i32) -> (i32, i32) {
    %c0_i32 = arith.constant 0 : i32
    %c0_i32_0 = arith.constant 0 : i32
    return %c0_i32, %arg1 : i32, i32
  }
  func.func @transform_2(%arg0: i32, %arg1: i32) -> (i32, i32) {
    %c0_i32 = arith.constant 0 : i32
    %c0_i32_0 = arith.constant 0 : i32
    return %c0_i32, %arg1 : i32, i32
  }
  func.func @transform_3(%arg0: i32, %arg1: i32) -> (i32, i32) {
    %c0_i32 = arith.constant 0 : i32
    %c0_i32_0 = arith.constant 0 : i32
    return %arg1, %c0_i32 : i32, i32
  }
  func.func @transform_4(%arg0: i32, %arg1: i32) -> (i32, i32) {
    %c0_i32 = arith.constant 0 : i32
    %c0_i32_0 = arith.constant 0 : i32
    %c0_i32_1 = arith.constant 0 : i32
    return %c0_i32, %c0_i32_0 : i32, i32
  }
  func.func @transform_5(%arg0: i32, %arg1: i32) -> (i32, i32) {
    %c0_i32 = arith.constant 0 : i32
    %c0_i32_0 = arith.constant 0 : i32
    %c0_i32_1 = arith.constant 0 : i32
    return %c0_i32, %c0_i32_0 : i32, i32
  }
  func.func @transform_6(%arg0: i32, %arg1: i32) -> (i32, i32) {
    %c0_i32 = arith.constant 0 : i32
    %c0_i32_0 = arith.constant 0 : i32
    %c0_i32_1 = arith.constant 0 : i32
    return %c0_i32, %c0_i32_0 : i32, i32
  }
  func.func @transform_7(%arg0: i32, %arg1: i32) -> (i32, i32) {
    %c0_i32 = arith.constant 0 : i32
    %c0_i32_0 = arith.constant 0 : i32
    return %arg0, %c0_i32 : i32, i32
  }
}

</mosaic_0001>

<bundles_post_ra>
// kernel: transformer_fwd.26
= control target key start
LH: loop header
LB: loop body
LE: loop exit
PB: predicated region body
PF: predicated region fallthrough
CT: control target
= control target key end

     0   :  { %vm38_vm0 = vcmask 261120   ;;  %vm58_vm1 = vcmask 257024   ;;  %s118_s1 = inlined_call_operand.vmem [shape: bf16[32,32], index: 1, kind: input, shape index: {}]   ;;  %s119_s0 = inlined_call_operand.vmem [shape: f32[16,32], index: 0, kind: input, shape index: {}]   ;;  %s120_s2 = inlined_call_operand.vmem [shape: f32[1,32], index: 2, kind: input, shape index: {}]   ;;  %s121_s3 = inlined_call_operand.vmem [shape: bf16[16,32], index: 3, kind: output, shape index: {}]  }
   0x1   :  { %v75_v0 = vld [vmem:[%s118_s1 + $0x8] sm:$0xff]  ;;  %v74_v1 = vld [vmem:[%s118_s1] sm:$0xff] }
   0x2   :  { %48 = vmatpush.bf16.msra.mxu0 %v75_v0  ;;  %v15_v2 = vld [vmem:[%s119_s0] sm:$0xff]  ;;  %v16_v3 = vld [vmem:[%s119_s0 + $0x8] sm:$0xff] }
   0x3   :  { %v17_v4 = vpack.c.bf16 %v16_v3, %v15_v2  ;;  %v76_v5 = vld [vmem:[%s120_s2] ss:$0 sm:$0xff] }
   0x6   :  { %49 = vmatpush.bf16.msra.mxu0 %v74_v1 }
   0x9   :  { %73 = vmatmul.msk.bf16.vlgmr.msra.gmra.mxu0 %vm38_vm0, %v17_v4 }
  0x86   :  { %v51_v6 = vpop.f32.mrf.mxu0 }
  0x87   :  { %v52_v7 = vadd.f32 %v76_v5, %v51_v6 }
  0x89   :  { %v56_v8 = vpack.c.bf16 %v52_v7, %v52_v7 }
  0x8b   :  { %59 = vst.msk [vmem:[%s121_s3] sm:$0xf] %vm58_vm1, %v56_v8 }
  0x8e   :  { %v53_v9 = vpop.f32.mrf.mxu0 }
  0x8f   :  { %v54_v10 = vadd.f32 %v76_v5, %v53_v9 }
  0x91   :  { %v57_v11 = vpack.c.bf16 %v54_v10, %v54_v10 }
  0x93   :  { %60 = vst.msk [vmem:[%s121_s3 + $0x4] sm:$0xf] %vm58_vm1, %v57_v11 }

// kernel: transformer_fwd.24
= control target key start
LH: loop header
LB: loop body
LE: loop exit
PB: predicated region body
PF: predicated region fallthrough
CT: control target
= control target key end

     0   :  { %vm38_vm0 = vcmask 261120   ;;  %vm58_vm1 = vcmask 781312   ;;  %s118_s1 = inlined_call_operand.vmem [shape: bf16[32,96], index: 1, kind: input, shape index: {}]   ;;  %s119_s0 = inlined_call_operand.vmem [shape: f32[16,32], index: 0, kind: input, shape index: {}]   ;;  %s120_s2 = inlined_call_operand.vmem [shape: f32[1,96], index: 2, kind: input, shape index: {}]   ;;  %s121_s3 = inlined_call_operand.vmem [shape: bf16[16,96], index: 3, kind: output, shape index: {}]  }
   0x1   :  { %v75_v0 = vld [vmem:[%s118_s1 + $0x8] sm:$0xff]  ;;  %v74_v1 = vld [vmem:[%s118_s1] sm:$0xff] }
   0x2   :  { %48 = vmatpush.bf16.msra.mxu0 %v75_v0  ;;  %v15_v2 = vld [vmem:[%s119_s0] sm:$0xff]  ;;  %v16_v3 = vld [vmem:[%s119_s0 + $0x8] sm:$0xff] }
   0x3   :  { %v17_v4 = vpack.c.bf16 %v16_v3, %v15_v2  ;;  %v76_v5 = vld [vmem:[%s120_s2] ss:$0 sm:$0xff] }
   0x6   :  { %49 = vmatpush.bf16.msra.mxu0 %v74_v1 }
   0x9   :  { %73 = vmatmul.msk.bf16.vlgmr.msra.gmra.mxu0 %vm38_vm0, %v17_v4 }
  0x86   :  { %v51_v6 = vpop.f32.mrf.mxu0 }
  0x87   :  { %v52_v7 = vadd.f32 %v76_v5, %v51_v6 }
  0x89   :  { %v56_v8 = vpack.c.bf16 %v52_v7, %v52_v7 }
  0x8b   :  { %59 = vst.msk [vmem:[%s121_s3] sm:$0xf] %vm58_vm1, %v56_v8 }
  0x8e   :  { %v53_v9 = vpop.f32.mrf.mxu0 }
  0x8f   :  { %v54_v10 = vadd.f32 %v76_v5, %v53_v9 }
  0x91   :  { %v57_v11 = vpack.c.bf16 %v54_v10, %v54_v10 }
  0x93   :  { %60 = vst.msk [vmem:[%s121_s3 + $0x4] sm:$0xf] %vm58_vm1, %v57_v11 }

// kernel: transformer_fwd.27
= control target key start
LH: loop header
LB: loop body
LE: loop exit
PB: predicated region body
PF: predicated region fallthrough
CT: control target
= control target key end

     0   :  { %vm38_vm0 = vcmask 261120   ;;  %vm58_vm1 = vcmask 519168   ;;  %s118_s1 = inlined_call_operand.vmem [shape: bf16[32,64], index: 1, kind: input, shape index: {}]   ;;  %s119_s0 = inlined_call_operand.vmem [shape: f32[16,32], index: 0, kind: input, shape index: {}]   ;;  %s120_s2 = inlined_call_operand.vmem [shape: f32[1,64], index: 2, kind: input, shape index: {}]   ;;  %s121_s3 = inlined_call_operand.vmem [shape: bf16[16,64], index: 3, kind: output, shape index: {}]  }
   0x1   :  { %v75_v0 = vld [vmem:[%s118_s1 + $0x8] sm:$0xff]  ;;  %v74_v1 = vld [vmem:[%s118_s1] sm:$0xff] }
   0x2   :  { %48 = vmatpush.bf16.msra.mxu0 %v75_v0  ;;  %v15_v2 = vld [vmem:[%s119_s0] sm:$0xff]  ;;  %v16_v3 = vld [vmem:[%s119_s0 + $0x8] sm:$0xff] }
   0x3   :  { %v17_v4 = vpack.c.bf16 %v16_v3, %v15_v2  ;;  %v76_v5 = vld [vmem:[%s120_s2] ss:$0 sm:$0xff] }
   0x6   :  { %49 = vmatpush.bf16.msra.mxu0 %v74_v1 }
   0x9   :  { %73 = vmatmul.msk.bf16.vlgmr.msra.gmra.mxu0 %vm38_vm0, %v17_v4 }
  0x86   :  { %v51_v6 = vpop.f32.mrf.mxu0 }
  0x87   :  { %v52_v7 = vadd.f32 %v76_v5, %v51_v6 }
  0x89   :  { %v56_v8 = vpack.c.bf16 %v52_v7, %v52_v7 }
  0x8b   :  { %59 = vst.msk [vmem:[%s121_s3] sm:$0xf] %vm58_vm1, %v56_v8 }
  0x8e   :  { %v53_v9 = vpop.f32.mrf.mxu0 }
  0x8f   :  { %v54_v10 = vadd.f32 %v76_v5, %v53_v9 }
  0x91   :  { %v57_v11 = vpack.c.bf16 %v54_v10, %v54_v10 }
  0x93   :  { %60 = vst.msk [vmem:[%s121_s3 + $0x4] sm:$0xf] %vm58_vm1, %v57_v11 }

// kernel: transformer_fwd.20
= control target key start
LH: loop header
LB: loop body
LE: loop exit
PB: predicated region body
PF: predicated region fallthrough
CT: control target
= control target key end

     0   :  { %vm31_vm0 = vcmask 261120   ;;  %v262_v9 = vmov 0.0   ;;  %vm112_vm1 = vcmask 523264   ;;  %v263_v33 = vmov 32.0   ;;  %s357_s1 = inlined_call_operand.vmem [shape: bf16[32,64], index: 1, kind: input, shape index: {}]   ;;  %s358_s0 = inlined_call_operand.vmem [shape: f32[16,32], index: 0, kind: input, shape index: {}]   ;;  %s359_s2 = inlined_call_operand.vmem [shape: f32[1,64], index: 2, kind: input, shape index: {}]   ;;  %s360_s3 = inlined_call_operand.vmem [shape: bf16[64,32], index: 3, kind: input, shape index: {}]   ;;  %s361_s4 = inlined_call_operand.vmem [shape: f32[1,32], index: 4, kind: input, shape index: {}]   ;;  %s362_s5 = inlined_call_operand.vmem [shape: f32[1,32], index: 5, kind: input, shape index: {}]   ;;  %s363_s6 = inlined_call_operand.vmem [shape: f32[1,32], index: 6, kind: input, shape index: {}]   ;;  %s364_s7 = inlined_call_operand.vmem [shape: f32[16,32], index: 7, kind: output, shape index: {}]  }
   0x1   :  { %v245_v0 = vld [vmem:[%s357_s1 + $0x8] sm:$0xff]  ;;  %v244_v1 = vld [vmem:[%s357_s1] sm:$0xff]  ;;  %v249_v5 = vld [vmem:[%s360_s3 + $0x18] sm:$0xff]  ;;  %32 = vst.msk [vmem:[#allocation2] sm:$0xff] %vm31_vm0, %v262_v9  ;;  %256 = vrcp.f32 %v263_v33 }
   0x2   :  { %67 = vmatpush.bf16.msra.mxu0 %v245_v0  ;;  %v34_v2 = vld [vmem:[%s358_s0] sm:$0xff]  ;;  %v35_v3 = vld [vmem:[%s358_s0 + $0x8] sm:$0xff]  ;;  %120 = vmatpush.bf16.msra.mxu1 %v249_v5  ;;  %v248_v6 = vld [vmem:[%s360_s3 + $0x10] sm:$0xff]  ;;  %33 = vst.msk [vmem:[#allocation2 + $0x8] sm:$0xff] %vm31_vm0, %v262_v9 }
   0x3   :  { %v36_v4 = vpack.c.bf16 %v35_v3, %v34_v2  ;;  %v247_v7 = vld [vmem:[%s360_s3 + $0x8] sm:$0xff]  ;;  %v246_v8 = vld [vmem:[%s360_s3] sm:$0xff] }
   0x4   :  { %v252_v11 = vld [vmem:[%s359_s2] ss:$0 sm:$0xff] }
   0x5   :  { %v253_v24 = vld [vmem:[%s361_s4] ss:$0 sm:$0xff] }
   0x6   :  { %68 = vmatpush.bf16.msra.mxu0 %v244_v1  ;;  %121 = vmatpush.bf16.msra.mxu1 %v248_v6  ;;  %v254_v0 = vld [vmem:[%s362_s5] ss:$0 sm:$0xff] }
   0x7   :  { %v257_v34 = vpop.eup %256 }
   0x8   :  { %v77_v18 = vld [vmem:[#allocation2] sm:$0xff]  ;;  %v156_v35 = vmul.f32 32.0, %v257_v34  ;;  %vm160_vm2 = vweird.f32 %v257_v34 }
   0x9   :  { %226 = vmatmul.msk.bf16.vlgmr.msra.gmra.mxu0 %vm31_vm0, %v36_v4  ;;  %v78_v21 = vld [vmem:[#allocation2 + $0x8] sm:$0xff] }
   0xa   :  { %122 = vmatpush.bf16.msra.mxu1 %v247_v7  ;;  %v157_v36 = vsub.f32 1.0, %v156_v35 }
   0xc   :  { %v158_v37 = vmul.f32 %v257_v34, %v157_v36 }
   0xe   :  { %123 = vmatpush.bf16.msra.mxu1 %v246_v8  ;;  %v159_v38 = vadd.f32 %v257_v34, %v158_v37 }
  0x10   :  { %v161_v39 = vsel %vm160_vm2, %v257_v34, %v159_v38 }
  0x86   :  { %v70_v10 = vpop.f32.mrf.mxu0 }
  0x87   :  { %v71_v12 = vadd.f32 %v252_v11, %v70_v10 }
  0x89   :  { %v75_v15 = vmax.f32 %v71_v12, 0.0 }
  0x8e   :  { %v72_v13 = vpop.f32.mrf.mxu0 }
  0x8f   :  { %v73_v14 = vadd.f32 %v252_v11, %v72_v13 }
  0x91   :  { %v76_v16 = vmax.f32 %v73_v14, 0.0 }
  0x93   :  { %v79_v17 = vpack.c.bf16 %v76_v16, %v75_v15 }
  0x95   :  { %243 = vmatmul.msk.bf16.vlgmr.msra.gmra.mxu1 %vm112_vm1, %v79_v17 }
 0x112   :  { %v125_v19 = vpop.f32.mrf.mxu1 }
 0x113   :  { %v130_v20 = vadd.f32 %v125_v19, %v77_v18 }
 0x115   :  { %132 = vst.msk [vmem:[#allocation2] sm:$0xff] %vm31_vm0, %v130_v20 }
 0x11a   :  { %v127_v22 = vpop.f32.mrf.mxu1 }
 0x11b   :  { %v131_v23 = vadd.f32 %v127_v22, %v78_v21 }
 0x11c   :  { %v139_v25 = vld [vmem:[#allocation2] sm:$0xff] }
 0x11d   :  { %133 = vst.msk [vmem:[#allocation2 + $0x8] sm:$0xff] %vm31_vm0, %v131_v23  ;;  %v141_v26 = vadd.f32 %v139_v25, %v34_v2 }
 0x11f   :  { %v147_v27 = vadd.f32 %v253_v24, %v141_v26 }
 0x121   :  { %v149_v28 = vsel %vm31_vm0, %v147_v27, 0.0 }
 0x122   :  { %150 = vadd.xlane.f32.xlu0 %v149_v28 }
 0x124   :  { %v140_v29 = vld [vmem:[#allocation2 + $0x8] sm:$0xff] }
 0x125   :  { %v142_v30 = vadd.f32 %v140_v29, %v35_v3  ;;  %v255_v3 = vld [vmem:[%s363_s6] ss:$0 sm:$0xff] }
 0x127   :  { %v148_v31 = vadd.f32 %v253_v24, %v142_v30 }
 0x129   :  { %v152_v32 = vsel %vm31_vm0, %v148_v31, 0.0 }
 0x12a   :  { %153 = vadd.xlane.f32.xlu0 %v152_v32 }
 0x195   :  { %v151_v40 = vpop.xlane.xlu0 %150 }
 0x196   :  { %v162_v41 = vmul.f32 %v161_v39, %v151_v40 }
 0x198   :  { %v164_v42 = vsub.f32 %v147_v27, %v162_v41 }
 0x19a   :  { %v166_v43 = vmul.f32 %v164_v42, %v164_v42 }
 0x19c   :  { %v168_v44 = vsel %vm31_vm0, %v166_v43, 0.0 }
 0x19d   :  { %169 = vadd.xlane.f32.xlu1 %v168_v44  ;;  %v154_v45 = vpop.xlane.xlu0 %153 }
 0x19e   :  { %v163_v46 = vmul.f32 %v161_v39, %v154_v45 }
 0x1a0   :  { %v165_v47 = vsub.f32 %v148_v31, %v163_v46 }
 0x1a2   :  { %v167_v48 = vmul.f32 %v165_v47, %v165_v47 }
 0x1a4   :  { %v171_v49 = vsel %vm31_vm0, %v167_v48, 0.0 }
 0x1a5   :  { %172 = vadd.xlane.f32.xlu1 %v171_v49 }
 0x210   :  { %v170_v50 = vpop.xlane.xlu1 %169 }
 0x211   :  { %v174_v51 = vmul.f32 %v170_v50, %v161_v39 }
 0x213   :  { %v176_v52 = vadd.f32 1e-05, %v174_v51 }
 0x215   :  { %258 = vrsqrt.f32 %v176_v52  ;;  %vm184_vm4 = vweird.f32 %v176_v52 }
 0x218   :  { %v173_v53 = vpop.xlane.xlu1 %172 }
 0x219   :  { %v175_v54 = vmul.f32 %v173_v53, %v161_v39 }
 0x21b   :  { %v259_v55 = vpop.eup %258  ;;  %v177_v56 = vadd.f32 1e-05, %v175_v54 }
 0x21c   :  { %v179_v57 = vmul.f32 %v259_v55, %v176_v52  ;;  %vm185_vm3 = vweird.f32 %v259_v55 }
 0x21d   :  { %260 = vrsqrt.f32 %v177_v56  ;;  %vm186_vm5 = vmor %vm184_vm4, %vm185_vm3  ;;  %vm194_vm7 = vweird.f32 %v177_v56 }
 0x21e   :  { %v180_v58 = vmul.f32 %v259_v55, %v179_v57 }
 0x220   :  { %v181_v59 = vmul.f32 0.5, %v180_v58 }
 0x222   :  { %v182_v60 = vsub.f32 1.5, %v181_v59 }
 0x223   :  { %v261_v61 = vpop.eup %260 }
 0x224   :  { %v183_v62 = vmul.f32 %v259_v55, %v182_v60  ;;  %v189_v63 = vmul.f32 %v261_v61, %v177_v56  ;;  %vm195_vm6 = vweird.f32 %v261_v61 }
 0x225   :  { %vm196_vm8 = vmor %vm194_vm7, %vm195_vm6 }
 0x226   :  { %v187_v1 = vsel %vm186_vm5, %v259_v55, %v183_v62  ;;  %v190_v2 = vmul.f32 %v261_v61, %v189_v63 }
 0x227   :  { %v198_v4 = vmul.f32 %v187_v1, %v164_v42 }
 0x228   :  { %v191_v5 = vmul.f32 0.5, %v190_v2 }
 0x229   :  { %v204_v6 = vmul.f32 %v254_v0, %v198_v4 }
 0x22a   :  { %v192_v7 = vsub.f32 1.5, %v191_v5 }
 0x22b   :  { %v210_v8 = vadd.f32 %v255_v3, %v204_v6 }
 0x22c   :  { %v193_v9 = vmul.f32 %v261_v61, %v192_v7 }
 0x22d   :  { %212 = vst.msk [vmem:[%s364_s7] sm:$0xff] %vm31_vm0, %v210_v8 }
 0x22e   :  { %v197_v10 = vsel %vm196_vm8, %v261_v61, %v193_v9 }
 0x22f   :  { %v199_v11 = vmul.f32 %v197_v10, %v165_v47 }
 0x231   :  { %v205_v12 = vmul.f32 %v254_v0, %v199_v11 }
 0x233   :  { %v211_v13 = vadd.f32 %v255_v3, %v205_v12 }
 0x235   :  { %213 = vst.msk [vmem:[%s364_s7 + $0x8] sm:$0xff] %vm31_vm0, %v211_v13 }

// kernel: transformer_fwd.25
= control target key start
LH: loop header
LB: loop body
LE: loop exit
PB: predicated region body
PF: predicated region fallthrough
CT: control target
= control target key end

     0   :  { %s1400_s27 = smov 0   ;;  %s1402_s28 = smov 0   ;;  %s1568_s0 = inlined_call_operand.vmem [shape: bf16[2,4,8,8], index: 0, kind: input, shape index: {}]   ;;  %s1569_s1 = inlined_call_operand.vmem [shape: bf16[2,4,8,8], index: 1, kind: input, shape index: {}]   ;;  %s1570_s2 = inlined_call_operand.vmem [shape: bf16[2,4,8,8], index: 2, kind: input, shape index: {}]   ;;  %s1571_s3 = inlined_call_operand.vmem [shape: f32[2,8,32], index: 3, kind: input, shape index: {}]   ;;  %s1572_s4 = inlined_call_operand.vmem [shape: bf16[32,32], index: 4, kind: input, shape index: {}]   ;;  %s1573_s5 = inlined_call_operand.vmem [shape: f32[1,32], index: 5, kind: input, shape index: {}]   ;;  %s1574_s6 = inlined_call_operand.vmem [shape: f32[1,32], index: 6, kind: input, shape index: {}]   ;;  %s1575_s7 = inlined_call_operand.vmem [shape: f32[1,32], index: 7, kind: input, shape index: {}]   ;;  %s1576_s8 = inlined_call_operand.vmem [shape: f32[2,8,32], index: 8, kind: output, shape index: {}]  }
   0x1   :  { %s1404_s29 = smov 0  }
   0x2 LB: > { %s44_s30 = sadd.s32 1, %s1342_s28  ;;  %p1217_p0 = scmp.ge.s32.totalorder %s1346_s29, 1  ;;  %s1346_s29 = sphi %s1404_s29, %s18_s29   ;;  %s1342_s28 = sphi %s1402_s28, %s1578_s28   ;;  %s1338_s27 = sphi %s1400_s27, %s1577_s27  }
   0x3   : > { %p46_p1 = scmp.ge.s32.totalorder %s44_s30, 2  ;;  %p371_p2 = scmp.lt.s32.totalorder %s1346_s29, 3 }
   0x5   : > { %s1580_s30 = smov (%p46_p1, %s44_s30), 0  ;;  %p372_p3 = pnand %p1217_p0, %p371_p2 }
   0x6   : > { %p451_p4 = scmp.lt.s32.totalorder (!%p372_p3), %s1338_s27, 1  ;;  %s1351_s19 = smov (!%p372_p3), 8  }
   0x7   : > { %375 = sbr.rel (%p372_p3) target bundleno = 1510 (0x5e6), region = 52  ;;  %s1352_s20 = smov (!%p372_p3), 24  }
   0x8   : > { %s1353_s21 = smov (!%p372_p3), 16  }
   0xc   : > { %s1582_s27 = smov (!%p451_p4, %s1338_s27), 1  ;;  %vm535_vm0 = vcmask 64512   ;;  %vm521_vm1 = vcmask 7168   ;;  %v1348_v9 = vmov -inf   ;;  %v1349_v22 = vmov 0  }
   0xd   : > { %s1421_s9 = sshll.u32 %s1582_s27, 4  ;;  %522 = vst.msk [vmem:[#allocation2] sm:$0xff] %vm521_vm1, %v1348_v9  ;;  %1290 = vset.pattern.permute.xlu0 %v1349_v22  ;;  %1291 = vset.pattern.permute.xlu2 %v1349_v22  ;;  %v1350_v23 = vmov 0.0   ;;  %vm591_vm2 = vcmask 1043456   ;;  %vm516_vm3 = vcmask 261120   ;;  %vm694_vm4 = vcmask 130112  }
   0xe   : > { %s1427_s12 = scalar_lea.vmem %s1569_s1, %s1421_s9  ;;  %s1439_s15 = scalar_lea.vmem %s1568_s0, %s1421_s9  ;;  %523 = vst.msk [vmem:[#allocation2 + $0x8] sm:$0xff] %vm521_vm1, %v1348_v9  ;;  %1292 = vset.pattern.permute.xlu1 %v1349_v22  ;;  %vm780_vm5 = vcmask 195712   ;;  %vm866_vm6 = vcmask 261312  }
   0xf   : > { %v533_v0 = vld [vmem:[%s1427_s12] sm:$0xf]  ;;  %v1229_v1 = vld [vmem:[%s1427_s12 + $0x4] sm:$0xf]  ;;  %v1239_v4 = vld [vmem:[%s1427_s12 + $0xc] sm:$0xf]  ;;  %s1477_s18 = scalar_lea.vmem %s1570_s2, %s1421_s9 }
  0x10   : > { %v540_v2 = vsel %vm535_vm0, %v533_v0, 0  ;;  %v621_v3 = vsel %vm535_vm0, %v1229_v1, 0  ;;  %v793_v5 = vsel %vm535_vm0, %v1239_v4, 0  ;;  %v532_v6 = vld [vmem:[%s1439_s15] sm:$0xf]  ;;  %524 = vst.msk [vmem:[#allocation2 + $0x10] sm:$0xff] %vm521_vm1, %v1348_v9 }
  0x11   : > { %549 = vmatpush.bf16.xpose.msra.mxu0 %v540_v2  ;;  %630 = vmatpush.bf16.xpose.msra.mxu2 %v621_v3  ;;  %v1228_v7 = vld [vmem:[%s1439_s15 + $0x4] sm:$0xf]  ;;  %v1238_v8 = vld [vmem:[%s1439_s15 + $0xc] sm:$0xf]  ;;  %525 = vst.msk [vmem:[#allocation2 + $0x18] sm:$0xff] %vm521_vm1, %v1348_v9  ;;  %s1224_s26 = sshll.u32 %s1582_s27, 3 }
  0x12   : > { %526 = vst.msk [vmem:[#allocation3] sm:$0xff] %vm521_vm1, %v1350_v23  ;;  %v1230_v38 = vld [vmem:[%s1477_s18 + $0x4] sm:$0xf]  ;;  %v534_v40 = vld [vmem:[%s1477_s18] sm:$0xf]  ;;  %s495_s11 = scalar_lea.vmem %s1571_s3, %s1224_s26 }
  0x13   : > { %527 = vst.msk [vmem:[#allocation3 + $0x8] sm:$0xff] %vm521_vm1, %v1350_v23  ;;  %v674_v39 = vsel %vm591_vm2, %v1230_v38, 0  ;;  %v593_v41 = vsel %vm591_vm2, %v534_v40, 0  ;;  %v1234_v43 = vld [vmem:[%s1427_s12 + $0x8] sm:$0xf] }
  0x14   : > { %528 = vst.msk [vmem:[#allocation3 + $0x10] sm:$0xff] %vm521_vm1, %v1350_v23  ;;  %v556_v24 = vld [vmem:[#allocation2] sm:$0xff]  ;;  %683 = vmatpush.bf16.msra.mxu3 %v674_v39  ;;  %602 = vmatpush.bf16.msra.mxu1 %v593_v41  ;;  %v707_v45 = vsel %vm535_vm0, %v1234_v43, 0  ;;  %v1233_v60 = vld [vmem:[%s1439_s15 + $0x8] sm:$0xf] }
  0x15   : > { %529 = vst.msk [vmem:[#allocation3 + $0x18] sm:$0xff] %vm521_vm1, %v1350_v23  ;;  %v1462_v28 = vld [vmem:[#allocation2 + $0x8] sm:$0xff] }
  0x16   : > { %531 = vst.msk [vmem:[#allocation4] sm:$0xff] %vm516_vm3, %v1350_v23  ;;  %v1240_v4 = vld [vmem:[%s1477_s18 + $0xc] sm:$0xf] }
  0x17   : > { %517 = vst.msk [vmem:[#allocation5] sm:$0xff] %vm516_vm3, %v1350_v23  ;;  %v724_v23 = vld [vmem:[#allocation2 + $0x10] sm:$0xff] }
  0x18   : > { %1226 = vmatmul.msk.bf16.vlgmr.msra.gmra.mxu0 %vm535_vm0, %v532_v6  ;;  %1231 = vmatmul.msk.bf16.vlgmr.msra.gmra.mxu2 %vm535_vm0, %v1228_v7  ;;  %v810_v34 = vld [vmem:[#allocation2 + $0x18] sm:$0xff]  ;;  %v846_v6 = vsel %vm591_vm2, %v1240_v4, 0 }
  0x19   : > { %802 = vmatpush.bf16.xpose.msrb.mxu0 %v793_v5  ;;  %716 = vmatpush.bf16.xpose.msrb.mxu1 %v707_v45  ;;  %v572_v62 = vld [vmem:[#allocation3] sm:$0xff] }
  0x1a   : > { %855 = vmatpush.bf16.msrb.mxu2 %v846_v6  ;;  %v655_v45 = vld [vmem:[#allocation3 + $0x8] sm:$0xff] }
  0x1c   : > { %v827_v5 = vld [vmem:[#allocation3 + $0x18] sm:$0xff] }
  0x1d   : > { %v580_v9 = vld [vmem:[#allocation4] sm:$0xff] }
  0x28   : > { %1241 = vmatmul.msk.bf16.vlgmr.msrb.gmra.mxu0 %vm535_vm0, %v1238_v8 }
  0x95   : > { %v551_v10 = vpop.f32.mrf.mxu0 }
  0x96   : > { %v1451_v11 = vmul.f32 0.35355338, %v551_v10 }
  0x98   : > { %v557_v12 = vsel %vm535_vm0, %v1451_v11, -inf }
  0x99   : > { %558 = vmax.xlane.f32.xlu0 %v557_v12 }
  0x9b   : > { %v632_v13 = vpop.f32.mrf.mxu2 }
  0x9c   : > { %v636_v14 = vmul.f32 0.35355338, %v632_v13 }
  0x9d   : > { %v553_v15 = vpop.f32.mrf.mxu0 }
  0x9e   : > { %v639_v16 = vsel %vm535_vm0, %v636_v14, -inf }
  0x9f   : > { %640 = vmax.xlane.f32.xlu1 %v639_v16 }
  0xa3   : > { %v634_v17 = vpop.f32.mrf.mxu2 }
  0xa5   : > { %v804_v18 = vpop.f32.mrf.mxu0 }
  0xa6   : > { %v808_v19 = vmul.f32 0.35355338, %v804_v18 }
  0xa8   : > { %v811_v20 = vsel %vm535_vm0, %v808_v19, -inf }
  0xa9   : > { %812 = vmax.xlane.f32.xlu2 %v811_v20 }
  0xad   : > { %v806_v21 = vpop.f32.mrf.mxu0 }
 0x10c   : > { %v559_v25 = vpop.xlane.xlu0 %558 }
 0x10d   : > { %v560_v26 = vmax.f32 %v556_v24, %v559_v25 }
 0x10f   : > { %v561_v27 = vsub.f32 %v556_v24, %v560_v26  ;;  %610 = vst.msk [vmem:[#allocation2] sm:$0xff] %vm521_vm1, %v560_v26  ;;  %566 = vperm.xlu0 %1290, %v560_v26  }
 0x111   : > { %v562_v29 = vmul.f32 1.442695, %v561_v27 }
 0x112   : > { %v641_v30 = vpop.xlane.xlu1 %640 }
 0x113   : > { %1296 = vpow2.f32 %v562_v29  ;;  %v1465_v31 = vmax.f32 %v1462_v28, %v641_v30 }
 0x115   : > { %v643_v32 = vsub.f32 %v1462_v28, %v1465_v31  ;;  %696 = vst.msk [vmem:[#allocation2 + $0x8] sm:$0xff] %vm521_vm1, %v1465_v31  ;;  %648 = vperm.xlu2 %1291, %v1465_v31  }
 0x119   : > { %v1297_v33 = vpop.eup %1296 }
 0x11a   : > { %583 = vperm.xlu0 %1290, %v1297_v33   ;;  %v573_v63 = vmul.f32 %v1297_v33, %v572_v62 }
 0x11c   : > { %v813_v35 = vpop.xlane.xlu2 %812 }
 0x11d   : > { %v814_v36 = vmax.f32 %v810_v34, %v813_v35 }
 0x11f   : > { %v815_v37 = vsub.f32 %v810_v34, %v814_v36  ;;  %868 = vst.msk [vmem:[#allocation2 + $0x18] sm:$0xff] %vm521_vm1, %v814_v36  ;;  %820 = vperm.xlu2 %1291, %v814_v36   ;;  %v1235_v34 = vld [vmem:[%s1477_s18 + $0x8] sm:$0xf] }
 0x120   : > { %v760_v35 = vsel %vm591_vm2, %v1235_v34, 0 }
 0x121   : > { %v816_v61 = vmul.f32 1.442695, %v815_v37  ;;  %769 = vmatpush.bf16.msrb.mxu3 %v760_v35  ;;  %v644_v37 = vmul.f32 1.442695, %v643_v32 }
 0x16f   : > { %v649_v42 = vpop.permute.xlu2 %648 }
 0x170   : > { %v651_v44 = vsub.f32 %v636_v14, %v649_v42 }
 0x172   : > { %v652_v46 = vmul.f32 1.442695, %v651_v44 }
 0x174   : > { %1298 = vpow2.f32 %v652_v46 }
 0x179   : > { %v821_v49 = vpop.permute.xlu2 %820 }
 0x17a   : > { %v1487_v47 = vpop.eup %1298  ;;  %v823_v52 = vsub.f32 %v808_v19, %v821_v49 }
 0x17b   : > { %v669_v48 = vpack.c.bf16 %v1487_v47, %v1487_v47  ;;  %v657_v36 = vsel %vm535_vm0, %v1487_v47, 0.0 }
 0x17c   : > { %v824_v54 = vmul.f32 1.442695, %v823_v52 }
 0x17d   : > { %1232 = vmatmul.msk.bf16.vlgmr.msra.gmra.mxu3 %vm535_vm0, %v669_v48 }
 0x181   : > { %v567_v50 = vpop.permute.xlu0 %566 }
 0x182   : > { %v569_v51 = vsub.f32 %v1451_v11, %v567_v50 }
 0x184   : > { %v570_v53 = vmul.f32 1.442695, %v569_v51 }
 0x186   : > { %1300 = vpow2.f32 %v570_v53 }
 0x187   : > { %1302 = vpow2.f32 %v824_v54  ;;  %v741_v54 = vld [vmem:[#allocation3 + $0x10] sm:$0xff] }
 0x188   : > { %1304 = vpow2.f32 %v816_v61 }
 0x18c   : > { %v1301_v55 = vpop.eup %1300  ;;  %v584_v10 = vpop.permute.xlu0 %583 }
 0x18d   : > { %v574_v56 = vsel %vm535_vm0, %v1301_v55, 0.0  ;;  %v587_v57 = vpack.c.bf16 %v1301_v55, %v1301_v55  ;;  %v1303_v58 = vpop.eup %1302  ;;  %v586_v14 = vmul.f32 %v584_v10, %v580_v9 }
 0x18e   : > { %575 = vadd.xlane.f32.xlu2 %v574_v56  ;;  %v829_v59 = vsel %vm535_vm0, %v1303_v58, 0.0  ;;  %v1498_v3 = vpop.eup %1304  ;;  %v841_v7 = vpack.c.bf16 %v1303_v58, %v1303_v58 }
 0x18f   : > { %1227 = vmatmul.msk.bf16.vlgmr.msra.gmra.mxu1 %vm535_vm0, %v587_v57  ;;  %v828_v8 = vmul.f32 %v1498_v3, %v827_v5 }
 0x190   : > { %1242 = vmatmul.msk.bf16.vlgmr.msrb.gmra.mxu2 %vm535_vm0, %v841_v7 }
 0x196   : > { %830 = vadd.xlane.f32.xlu2 %v829_v59 }
 0x19f   : > { %1236 = vmatmul.msk.bf16.vlgmr.msrb.gmra.mxu1 %vm535_vm0, %v1233_v60 }
 0x200   : > { %v685_v0 = vpop.f32.mrf.mxu3 }
 0x201   : > { %v576_v1 = vpop.xlane.xlu2 %575  ;;  %690 = vrot.lane.b32.xlu2 %v685_v0, %s1351_s19 }
 0x202   : > { %v577_v2 = vadd.f32 %v576_v1, %v573_v63 }
 0x204   : > { %579 = vst.msk [vmem:[#allocation3] sm:$0xff] %vm521_vm1, %v577_v2 }
 0x208   : > { %v687_v11 = vpop.f32.mrf.mxu3 }
 0x209   : > { %v831_v12 = vpop.xlane.xlu2 %830 }
 0x20a   : > { %v832_v13 = vadd.f32 %v831_v12, %v828_v8 }
 0x20b   : > { %v873_v15 = vld [vmem:[#allocation3] sm:$0xff] }
 0x20c   : > { %v604_v16 = vpop.f32.mrf.mxu1  ;;  %876 = vperm.xlu2 %1291, %v873_v15   ;;  %833 = vst.msk [vmem:[#allocation3 + $0x18] sm:$0xff] %vm521_vm1, %v832_v13 }
 0x20d   : > { %v608_v17 = vadd.f32 %v604_v16, %v586_v14 }
 0x20f   : > { %609 = vst.msk [vmem:[#allocation4] sm:$0xff] %vm535_vm0, %v608_v17 }
 0x213   : > { %v857_v30 = vpop.f32.mrf.mxu2  ;;  %v942_v46 = vld [vmem:[#allocation3 + $0x18] sm:$0xff] }
 0x214   : > { %v606_v18 = vpop.f32.mrf.mxu1 }
 0x216   : > { %v662_v48 = vld [vmem:[#allocation4] sm:$0xff] }
 0x21b   : > { %v859_v33 = vpop.f32.mrf.mxu2 }
 0x21c   : > { %v718_v19 = vpop.f32.mrf.mxu1  ;;  %v1257_v33 = vld [vmem:[%s1572_s4] sm:$0xff] }
 0x21d   : > { %v722_v20 = vmul.f32 0.35355338, %v718_v19 }
 0x21f   : > { %v725_v21 = vsel %vm535_vm0, %v722_v20, -inf }
 0x220   : > { %726 = vmax.xlane.f32.xlu1 %v725_v21 }
 0x224   : > { %v720_v22 = vpop.f32.mrf.mxu1 }
 0x25b   : > { %v691_v51 = vpop.permute.xlu2 %690 }
 0x266   : > { %v877_v61 = vpop.permute.xlu2 %876 }
 0x267   : > { %v890_v15 = vand.u32 2147483648, %v877_v61  ;;  %vm884_vm8 = vweird.f32 %v877_v61  ;;  %v888_v17 = vand.u32 2147483647, %v877_v61 }
 0x269   : > { %vm889_vm10 = vcmp.eq.f32.partialorder %v888_v17, 8.507059e+37 }
 0x293   : > { %v727_v24 = vpop.xlane.xlu1 %726 }
 0x294   : > { %v728_v25 = vmax.f32 %v724_v23, %v727_v24 }
 0x296   : > { %v729_v26 = vsub.f32 %v724_v23, %v728_v25  ;;  %782 = vst.msk [vmem:[#allocation2 + $0x10] sm:$0xff] %vm521_vm1, %v728_v25  ;;  %734 = vperm.xlu1 %1292, %v728_v25  }
 0x298   : > { %v730_v27 = vmul.f32 1.442695, %v729_v26 }
 0x29a   : > { %1306 = vpow2.f32 %v730_v27  ;;  %v1258_v27 = vld [vmem:[%s1572_s4 + $0x8] sm:$0xff] }
 0x29b   : > { %1308 = vpow2.f32 %v644_v37  ;;  %993 = vmatpush.bf16.msra.mxu1 %v1258_v27 }
 0x29f   : > { %994 = vmatpush.bf16.msra.mxu1 %v1257_v33 }
 0x2a0   : > { %v1307_v29 = vpop.eup %1306 }
 0x2a1   : > { %751 = vperm.xlu0 %1290, %v1307_v29   ;;  %v1309_v38 = vpop.eup %1308  ;;  %v742_v55 = vmul.f32 %v1307_v29, %v741_v54 }
 0x2a2   : > { %v656_v28 = vmul.f32 %v1309_v38, %v655_v45 }
 0x2c0   : > { %658 = vadd.xlane.f32.xlu1 %v657_v36 }
 0x2d9   : > { %665 = vperm.xlu1 %1292, %v1309_v38  }
 0x308   : > { %v735_v39 = vpop.permute.xlu1 %734 }
 0x309   : > { %v737_v40 = vsub.f32 %v722_v20, %v735_v39  ;;  %v891_v20 = vor.u32 1.1754944e-38, %v890_v15 }
 0x30b   : > { %v738_v41 = vmul.f32 1.442695, %v737_v40 }
 0x30d   : > { %1310 = vpow2.f32 %v738_v41 }
 0x30e   : > { %1312 = vrcp.f32 %v877_v61 }
 0x313   : > { %v1311_v42 = vpop.eup %1310  ;;  %v752_v53 = vpop.permute.xlu0 %751 }
 0x314   : > { %v743_v43 = vsel %vm535_vm0, %v1311_v42, 0.0  ;;  %v755_v44 = vpack.c.bf16 %v1311_v42, %v1311_v42  ;;  %v1313_v0 = vpop.eup %1312 }
 0x315   : > { %744 = vadd.xlane.f32.xlu0 %v743_v43  ;;  %v880_v5 = vmul.f32 %v1313_v0, %v877_v61  ;;  %vm885_vm7 = vweird.f32 %v1313_v0 }
 0x316   : > { %1237 = vmatmul.msk.bf16.vlgmr.msrb.gmra.mxu3 %vm535_vm0, %v755_v44  ;;  %vm886_vm9 = vmor %vm884_vm8, %vm885_vm7 }
 0x317   : > { %v881_v6 = vsub.f32 1.0, %v880_v5 }
 0x329   : > { %862 = vrot.lane.b32.xlu0 %v857_v30, %s1352_s20  ;;  %s508_s20 = scalar_lea.vmem %s1576_s8, %s1224_s26 }
 0x331   : > { %945 = vperm.xlu0 %1290, %v942_v46  }
 0x333   : > { %v659_v31 = vpop.xlane.xlu1 %658 }
 0x334   : > { %v660_v32 = vadd.f32 %v659_v31, %v656_v28 }
 0x336   : > { %661 = vst.msk [vmem:[#allocation3 + $0x8] sm:$0xff] %vm521_vm1, %v660_v32 }
 0x33d   : > { %v896_v47 = vld [vmem:[#allocation3 + $0x8] sm:$0xff] }
 0x33e   : > { %899 = vperm.xlu2 %1291, %v896_v47  }
 0x34b   : > { %v666_v49 = vpop.permute.xlu1 %665 }
 0x34c   : > { %v668_v50 = vmul.f32 %v666_v49, %v662_v48 }
 0x34e   : > { %v693_v52 = vadd.f32 %v691_v51, %v668_v50 }
 0x350   : > { %695 = vst.msk [vmem:[#allocation4] sm:$0xff] %vm694_vm4, %v693_v52 }
 0x357   : > { %v748_v62 = vld [vmem:[#allocation4] sm:$0xff] }
 0x358   : > { %v754_v63 = vmul.f32 %v752_v53, %v748_v62  ;;  %v964_v62 = vld [vmem:[#allocation5] sm:$0xff] }
 0x388   : > { %v745_v56 = vpop.xlane.xlu0 %744 }
 0x389   : > { %v746_v57 = vadd.f32 %v745_v56, %v742_v55 }
 0x38b   : > { %747 = vst.msk [vmem:[#allocation3 + $0x10] sm:$0xff] %vm521_vm1, %v746_v57 }
 0x392   : > { %v919_v60 = vld [vmem:[#allocation3 + $0x10] sm:$0xff] }
 0x398   : > { %v900_v2 = vpop.permute.xlu2 %899 }
 0x399   : > { %v771_v58 = vpop.f32.mrf.mxu3  ;;  %1314 = vrcp.f32 %v900_v2  ;;  %v913_v34 = vand.u32 2147483648, %v900_v2  ;;  %vm907_vm12 = vweird.f32 %v900_v2  ;;  %v911_v35 = vand.u32 2147483647, %v900_v2 }
 0x39a   : > { %776 = vrot.lane.b32.xlu1 %v771_v58, %s1353_s21 }
 0x39b   : > { %v863_v10 = vpop.permute.xlu0 %862  ;;  %v914_v39 = vor.u32 1.1754944e-38, %v913_v34  ;;  %vm912_vm14 = vcmp.eq.f32.partialorder %v911_v35, 8.507059e+37  ;;  %v1295_v34 = vld [vmem:[%s1575_s7] ss:$0 sm:$0xff] }
 0x39f   : > { %v1315_v8 = vpop.eup %1314 }
 0x3a0   : > { %v903_v12 = vmul.f32 %v1315_v8, %v900_v2  ;;  %vm908_vm11 = vweird.f32 %v1315_v8  ;;  %v1004_v2 = vld [vmem:[%s495_s11] sm:$0xff] }
 0x3a1   : > { %v773_v59 = vpop.f32.mrf.mxu3  ;;  %vm909_vm13 = vmor %vm907_vm12, %vm908_vm11 }
 0x3a2   : > { %837 = vperm.xlu1 %1292, %v1498_v3   ;;  %v882_v3 = vmul.f32 %v1313_v0, %v881_v6  ;;  %v904_v18 = vsub.f32 1.0, %v903_v12 }
 0x3a3   : > { %v946_v22 = vpop.permute.xlu0 %945 }
 0x3a4   : > { %v883_v14 = vadd.f32 %v1313_v0, %v882_v3  ;;  %v905_v21 = vmul.f32 %v1315_v8, %v904_v18  ;;  %v959_v53 = vand.u32 2147483648, %v946_v22  ;;  %v957_v54 = vand.u32 2147483647, %v946_v22 }
 0x3a6   : > { %v887_v19 = vsel %vm886_vm9, %v1313_v0, %v883_v14  ;;  %v906_v30 = vadd.f32 %v1315_v8, %v905_v21  ;;  %v960_v56 = vor.u32 1.1754944e-38, %v959_v53  ;;  %vm958_vm9 = vcmp.eq.f32.partialorder %v957_v54, 8.507059e+37 }
 0x3a7   : > { %v892_v23 = vsel %vm889_vm10, %v891_v20, %v887_v19 }
 0x3a8   : > { %v910_v37 = vsel %vm909_vm13, %v1315_v8, %v906_v30  ;;  %v1294_v30 = vld [vmem:[%s1574_s6] ss:$0 sm:$0xff] }
 0x3a9   : > { %v915_v41 = vsel %vm912_vm14, %v914_v39, %v910_v37 }
 0x3aa   : > { %922 = vperm.xlu1 %1292, %v919_v60  }
 0x40c   : > { %v777_v1 = vpop.permute.xlu1 %776 }
 0x40d   : > { %v779_v4 = vadd.f32 %v777_v1, %v754_v63 }
 0x40f   : > { %781 = vst.msk [vmem:[#allocation4] sm:$0xff] %vm780_vm5, %v779_v4  ;;  %v1293_v4 = vld [vmem:[%s1573_s5] ss:$0 sm:$0xff] }
 0x414   : > { %v838_v7 = vpop.permute.xlu1 %837 }
 0x416   : > { %v834_v9 = vld [vmem:[#allocation4] sm:$0xff] }
 0x417   : > { %v840_v11 = vmul.f32 %v838_v7, %v834_v9  ;;  %v1354_v9 = vmov 32.0  }
 0x419   : > { %v865_v13 = vadd.f32 %v863_v10, %v840_v11 }
 0x41b   : > { %867 = vst.msk [vmem:[#allocation4] sm:$0xff] %vm866_vm6, %v865_v13 }
 0x41c   : > { %v923_v16 = vpop.permute.xlu1 %922 }
 0x41d   : > { %1316 = vrcp.f32 %v923_v16  ;;  %v936_v46 = vand.u32 2147483648, %v923_v16  ;;  %v934_v31 = vand.u32 2147483647, %v923_v16 }
 0x41e   : > { %1318 = vrcp.f32 %v946_v22 }
 0x41f   : > { %v937_v47 = vor.u32 1.1754944e-38, %v936_v46  ;;  %vm935_vm2 = vcmp.eq.f32.partialorder %v934_v31, 8.507059e+37  ;;  %1320 = vrcp.f32 %v1354_v9 }
 0x422   : > { %v872_v24 = vld [vmem:[#allocation4] sm:$0xff] }
 0x423   : > { %v1317_v25 = vpop.eup %1316  ;;  %v893_v26 = vmul.f32 %v892_v23, %v872_v24 }
 0x424   : > { %v926_v29 = vmul.f32 %v1317_v25, %v923_v16  ;;  %v1319_v38 = vpop.eup %1318  ;;  %vm931_vm15 = vweird.f32 %v1317_v25 }
 0x425   : > { %894 = vst.msk [vmem:[#allocation4] sm:$0xff] %vm535_vm0, %v893_v26  ;;  %v949_v43 = vmul.f32 %v1319_v38, %v946_v22  ;;  %vm930_vm0 = vweird.f32 %v923_v16  ;;  %vm954_vm7 = vweird.f32 %v1319_v38  ;;  %v1321_v3 = vpop.eup %1320 }
 0x426   : > { %v927_v36 = vsub.f32 1.0, %v926_v29  ;;  %vm932_vm1 = vmor %vm930_vm0, %vm931_vm15  ;;  %v1017_v10 = vmul.f32 32.0, %v1321_v3 }
 0x427   : > { %v950_v28 = vsub.f32 1.0, %v949_v43 }
 0x428   : > { %v928_v40 = vmul.f32 %v1317_v25, %v927_v36  ;;  %v1018_v11 = vsub.f32 1.0, %v1017_v10 }
 0x429   : > { %v951_v48 = vmul.f32 %v1319_v38, %v950_v28 }
 0x42a   : > { %v929_v45 = vadd.f32 %v1317_v25, %v928_v40  ;;  %v1019_v12 = vmul.f32 %v1321_v3, %v1018_v11 }
 0x42b   : > { %v952_v52 = vadd.f32 %v1319_v38, %v951_v48 }
 0x42c   : > { %v895_v42 = vld [vmem:[#allocation4] sm:$0xff]  ;;  %v933_v32 = vsel %vm932_vm1, %v1317_v25, %v929_v45  ;;  %v1020_v13 = vadd.f32 %v1321_v3, %v1019_v12 }
 0x42d   : > { %v916_v44 = vmul.f32 %v915_v41, %v895_v42  ;;  %v938_v50 = vsel %vm935_vm2, %v937_v47, %v933_v32 }
 0x42f   : > { %917 = vst.msk [vmem:[#allocation4] sm:$0xff] %vm694_vm4, %v916_v44  ;;  %vm953_vm4 = vweird.f32 %v946_v22 }
 0x430   : > { %vm955_vm8 = vmor %vm953_vm4, %vm954_vm7 }
 0x431   : > { %v956_v55 = vsel %vm955_vm8, %v1319_v38, %v952_v52 }
 0x432   : > { %v961_v57 = vsel %vm958_vm9, %v960_v56, %v956_v55 }
 0x436   : > { %v918_v49 = vld [vmem:[#allocation4] sm:$0xff] }
 0x437   : > { %v939_v51 = vmul.f32 %v938_v50, %v918_v49 }
 0x439   : > { %940 = vst.msk [vmem:[#allocation4] sm:$0xff] %vm780_vm5, %v939_v51  ;;  %vm1021_vm5 = vweird.f32 %v1321_v3 }
 0x43a   : > { %v1022_v14 = vsel %vm1021_vm5, %v1321_v3, %v1020_v13 }
 0x440   : > { %v941_v58 = vld [vmem:[#allocation4] sm:$0xff] }
 0x441   : > { %v962_v59 = vmul.f32 %v961_v57, %v941_v58 }
 0x443   : > { %963 = vst.msk [vmem:[#allocation4] sm:$0xff] %vm866_vm6, %v962_v59 }
 0x44a   : > { %v965_v60 = vld [vmem:[#allocation4] sm:$0xff] }
 0x44b   : > { %v966_v61 = vpack.c.bf16 %v965_v60, %v965_v60 }
 0x44d   : > { %1251 = vmatmul.msk.bf16.vlgmr.msra.gmra.mxu1 %vm516_vm3, %v966_v61 }
 0x4ca   : > { %v996_v63 = vpop.f32.mrf.mxu1 }
 0x4cb   : > { %v1000_v0 = vadd.f32 %v996_v63, %v964_v62 }
 0x4cd   : > { %1001 = vst.msk [vmem:[#allocation5] sm:$0xff] %vm516_vm3, %v1000_v0 }
 0x4d2   : > { %v998_v1 = vpop.f32.mrf.mxu1 }
 0x4d4   : > { %v1005_v5 = vld [vmem:[#allocation5] sm:$0xff] }
 0x4d5   : > { %v1006_v6 = vadd.f32 %v1005_v5, %v1004_v2 }
 0x4d7   : > { %v1011_v7 = vadd.f32 %v1293_v4, %v1006_v6 }
 0x4d9   : > { %v1013_v8 = vsel %vm516_vm3, %v1011_v7, 0.0 }
 0x4da   : > { %1014 = vadd.xlane.f32.xlu2 %v1013_v8 }
 0x54d   : > { %v1015_v15 = vpop.xlane.xlu2 %1014 }
 0x54e   : > { %v1023_v16 = vmul.f32 %v1022_v14, %v1015_v15 }
 0x550   : > { %v1024_v17 = vsub.f32 %v1011_v7, %v1023_v16 }
 0x552   : > { %v1025_v18 = vmul.f32 %v1024_v17, %v1024_v17 }
 0x554   : > { %v1026_v19 = vsel %vm516_vm3, %v1025_v18, 0.0 }
 0x555   : > { %1027 = vadd.xlane.f32.xlu1 %v1026_v19 }
 0x5c8   : > { %v1028_v20 = vpop.xlane.xlu1 %1027 }
 0x5c9   : > { %v1029_v21 = vmul.f32 %v1028_v20, %v1022_v14 }
 0x5cb   : > { %v1030_v22 = vadd.f32 1e-05, %v1029_v21 }
 0x5cd   : > { %1322 = vrsqrt.f32 %v1030_v22  ;;  %vm1037_vm10 = vweird.f32 %v1030_v22 }
 0x5d3   : > { %v1323_v23 = vpop.eup %1322 }
 0x5d4   : > { %v1032_v24 = vmul.f32 %v1323_v23, %v1030_v22  ;;  %vm1038_vm6 = vweird.f32 %v1323_v23 }
 0x5d5   : > { %vm1039_vm11 = vmor %vm1037_vm10, %vm1038_vm6 }
 0x5d6   : > { %v1033_v25 = vmul.f32 %v1323_v23, %v1032_v24 }
 0x5d8   : > { %v1034_v26 = vmul.f32 0.5, %v1033_v25 }
 0x5da   : > { %v1035_v27 = vsub.f32 1.5, %v1034_v26 }
 0x5dc   : > { %v1036_v29 = vmul.f32 %v1323_v23, %v1035_v27 }
 0x5de   : > { %v1040_v33 = vsel %vm1039_vm11, %v1323_v23, %v1036_v29 }
 0x5df   : > { %v1041_v35 = vmul.f32 %v1040_v33, %v1024_v17 }
 0x5e1   : > { %v1046_v36 = vmul.f32 %v1294_v30, %v1041_v35 }
 0x5e3   : > { %v1051_v37 = vadd.f32 %v1295_v34, %v1046_v36 }
 0x5e5   : > { %1052 = vst.msk [vmem:[%s508_s20] sm:$0xff] %vm516_vm3, %v1051_v37 }
 0x5e6 PF: > { %s18_s29 = sadd.s32 1, %s1346_s29   ;;  %s1577_s27 = smov %s1342_s28 }
 0x5e7   : > { %p15_p5 = scmp.ge.s32.totalorder %s18_s29, 4   ;;  %s1578_s28 = smov %s1580_s30 }
 0x5e9   :  { %17 = sbr.rel (!%p15_p5) target bundleno = 2 (0x2), region = 125 }

// kernel: transformer_fwd.35
= control target key start
LH: loop header
LB: loop body
LE: loop exit
PB: predicated region body
PF: predicated region fallthrough
CT: control target
= control target key end

     0   :  { %s401_s0 = inlined_call_operand.vmem [shape: f32[16,32], index: 0, kind: input, shape index: {}]   ;;  %s402_s1 = inlined_call_operand.vmem [shape: bf16[32,64], index: 1, kind: input, shape index: {}]   ;;  %s403_s2 = inlined_call_operand.vmem [shape: f32[1,64], index: 2, kind: input, shape index: {}]   ;;  %s404_s3 = inlined_call_operand.vmem [shape: bf16[64,32], index: 3, kind: input, shape index: {}]   ;;  %s405_s4 = inlined_call_operand.vmem [shape: f32[1,32], index: 4, kind: input, shape index: {}]   ;;  %s406_s5 = inlined_call_operand.vmem [shape: f32[1,32], index: 5, kind: input, shape index: {}]   ;;  %s407_s6 = inlined_call_operand.vmem [shape: f32[1,32], index: 6, kind: input, shape index: {}]   ;;  %s408_s7 = inlined_call_operand.hbm [shape: f32[16,32], index: 7, kind: output, shape index: {}]  }
   0x1   :  { %v260_v0 = vld [vmem:[%s402_s1 + $0x8] sm:$0xff]  ;;  %v259_v1 = vld [vmem:[%s402_s1] sm:$0xff] }
   0x2   :  { %v35_v2 = vld [vmem:[%s401_s0] sm:$0xff]  ;;  %v36_v3 = vld [vmem:[%s401_s0 + $0x8] sm:$0xff]  ;;  %68 = vmatpush.bf16.msra.mxu0 %v260_v0 }
   0x3   :  { %12 = vsyncpa [#allocation4], 0  ;;  %v37_v4 = vpack.c.bf16 %v36_v3, %v35_v2  ;;  %vm32_vm0 = vcmask 261120   ;;  %v264_v5 = vld [vmem:[%s404_s3 + $0x18] sm:$0xff]  ;;  %v263_v6 = vld [vmem:[%s404_s3 + $0x10] sm:$0xff]  ;;  %v306_v9 = vmov 0.0  }
   0x4   :  { %121 = vmatpush.bf16.msra.mxu1 %v264_v5  ;;  %v262_v7 = vld [vmem:[%s404_s3 + $0x8] sm:$0xff]  ;;  %v261_v8 = vld [vmem:[%s404_s3] sm:$0xff]  ;;  %33 = vst.msk [vmem:[#allocation2] sm:$0xff] %vm32_vm0, %v306_v9  ;;  %vm113_vm1 = vcmask 523264   ;;  %v307_v33 = vmov 32.0   ;;  %s221_s23 = sshll.u32 %s408_s7, 4  ;;  %s222_s23 = int_to_ptr.hbm [resolvable:$true] %s221_s23 }
   0x5   :  { %34 = vst.msk [vmem:[#allocation2 + $0x8] sm:$0xff] %vm32_vm0, %v306_v9  ;;  %v270_v11 = vld [vmem:[%s403_s2] ss:$0 sm:$0xff]  ;;  %274 = vrcp.f32 %v307_v33  ;;  %s310_s24 = smov 8  }
   0x6   :  { %69 = vmatpush.bf16.msra.mxu0 %v259_v1  ;;  %v271_v24 = vld [vmem:[%s405_s4] ss:$0 sm:$0xff] }
   0x7   :  { %v272_v0 = vld [vmem:[%s406_s5] ss:$0 sm:$0xff]  ;;  %s308_s5 = smov [#allocation3]  }
   0x8   :  { %122 = vmatpush.bf16.msra.mxu1 %v263_v6  ;;  %s219_s20 = sshll.u32 %s308_s5, 4  ;;  %s220_s20 = int_to_ptr.vmem [resolvable:$true] %s219_s20 }
   0x9   :  { %241 = vmatmul.msk.bf16.vlgmr.msra.gmra.mxu0 %vm32_vm0, %v37_v4  ;;  %v273_v4 = vld [vmem:[%s407_s6] ss:$0 sm:$0xff]  ;;  %s309_s6 = smov 128  }
   0xb   :  { %v78_v18 = vld [vmem:[#allocation2] sm:$0xff]  ;;  %v275_v34 = vpop.eup %274 }
   0xc   :  { %123 = vmatpush.bf16.msra.mxu1 %v262_v7  ;;  %v79_v21 = vld [vmem:[#allocation2 + $0x8] sm:$0xff]  ;;  %v157_v35 = vmul.f32 32.0, %v275_v34  ;;  %vm161_vm2 = vweird.f32 %v275_v34 }
   0xe   :  { %v158_v36 = vsub.f32 1.0, %v157_v35 }
  0x10   :  { %124 = vmatpush.bf16.msra.mxu1 %v261_v8  ;;  %v159_v37 = vmul.f32 %v275_v34, %v158_v36 }
  0x12   :  { %v160_v38 = vadd.f32 %v275_v34, %v159_v37 }
  0x14   :  { %v162_v39 = vsel %vm161_vm2, %v275_v34, %v160_v38 }
  0x86   :  { %v71_v10 = vpop.f32.mrf.mxu0 }
  0x87   :  { %v72_v12 = vadd.f32 %v270_v11, %v71_v10 }
  0x89   :  { %v76_v15 = vmax.f32 %v72_v12, 0.0 }
  0x8e   :  { %v73_v13 = vpop.f32.mrf.mxu0 }
  0x8f   :  { %v74_v14 = vadd.f32 %v270_v11, %v73_v13 }
  0x91   :  { %v77_v16 = vmax.f32 %v74_v14, 0.0 }
  0x93   :  { %v80_v17 = vpack.c.bf16 %v77_v16, %v76_v15 }
  0x95   :  { %258 = vmatmul.msk.bf16.vlgmr.msra.gmra.mxu1 %vm113_vm1, %v80_v17 }
 0x112   :  { %v126_v19 = vpop.f32.mrf.mxu1 }
 0x113   :  { %v131_v20 = vadd.f32 %v126_v19, %v78_v18 }
 0x115   :  { %133 = vst.msk [vmem:[#allocation2] sm:$0xff] %vm32_vm0, %v131_v20 }
 0x11a   :  { %v128_v22 = vpop.f32.mrf.mxu1 }
 0x11b   :  { %v132_v23 = vadd.f32 %v128_v22, %v79_v21 }
 0x11c   :  { %v140_v25 = vld [vmem:[#allocation2] sm:$0xff] }
 0x11d   :  { %134 = vst.msk [vmem:[#allocation2 + $0x8] sm:$0xff] %vm32_vm0, %v132_v23  ;;  %v142_v26 = vadd.f32 %v140_v25, %v35_v2 }
 0x11f   :  { %v148_v27 = vadd.f32 %v271_v24, %v142_v26 }
 0x121   :  { %v150_v28 = vsel %vm32_vm0, %v148_v27, 0.0 }
 0x122   :  { %151 = vadd.xlane.f32.xlu0 %v150_v28 }
 0x124   :  { %v141_v29 = vld [vmem:[#allocation2 + $0x8] sm:$0xff] }
 0x125   :  { %v143_v30 = vadd.f32 %v141_v29, %v36_v3 }
 0x127   :  { %v149_v31 = vadd.f32 %v271_v24, %v143_v30 }
 0x129   :  { %v153_v32 = vsel %vm32_vm0, %v149_v31, 0.0 }
 0x12a   :  { %154 = vadd.xlane.f32.xlu0 %v153_v32 }
 0x195   :  { %v152_v40 = vpop.xlane.xlu0 %151 }
 0x196   :  { %v163_v41 = vmul.f32 %v162_v39, %v152_v40 }
 0x198   :  { %v165_v42 = vsub.f32 %v148_v27, %v163_v41 }
 0x19a   :  { %v167_v43 = vmul.f32 %v165_v42, %v165_v42 }
 0x19c   :  { %v169_v44 = vsel %vm32_vm0, %v167_v43, 0.0 }
 0x19d   :  { %170 = vadd.xlane.f32.xlu1 %v169_v44  ;;  %v155_v45 = vpop.xlane.xlu0 %154 }
 0x19e   :  { %v164_v46 = vmul.f32 %v162_v39, %v155_v45 }
 0x1a0   :  { %v166_v47 = vsub.f32 %v149_v31, %v164_v46 }
 0x1a2   :  { %v168_v48 = vmul.f32 %v166_v47, %v166_v47 }
 0x1a4   :  { %v172_v49 = vsel %vm32_vm0, %v168_v48, 0.0 }
 0x1a5   :  { %173 = vadd.xlane.f32.xlu1 %v172_v49 }
 0x210   :  { %v171_v50 = vpop.xlane.xlu1 %170 }
 0x211   :  { %v175_v51 = vmul.f32 %v171_v50, %v162_v39 }
 0x213   :  { %v177_v52 = vadd.f32 1e-05, %v175_v51 }
 0x215   :  { %276 = vrsqrt.f32 %v177_v52  ;;  %vm185_vm4 = vweird.f32 %v177_v52 }
 0x218   :  { %v174_v53 = vpop.xlane.xlu1 %173 }
 0x219   :  { %v176_v54 = vmul.f32 %v174_v53, %v162_v39 }
 0x21b   :  { %v277_v55 = vpop.eup %276  ;;  %v178_v56 = vadd.f32 1e-05, %v176_v54 }
 0x21c   :  { %v180_v57 = vmul.f32 %v277_v55, %v177_v52  ;;  %vm186_vm3 = vweird.f32 %v277_v55 }
 0x21d   :  { %278 = vrsqrt.f32 %v178_v56  ;;  %vm187_vm5 = vmor %vm185_vm4, %vm186_vm3  ;;  %vm195_vm7 = vweird.f32 %v178_v56 }
 0x21e   :  { %v181_v58 = vmul.f32 %v277_v55, %v180_v57 }
 0x220   :  { %v182_v59 = vmul.f32 0.5, %v181_v58 }
 0x222   :  { %v183_v60 = vsub.f32 1.5, %v182_v59 }
 0x223   :  { %v279_v61 = vpop.eup %278 }
 0x224   :  { %v184_v62 = vmul.f32 %v277_v55, %v183_v60  ;;  %v190_v63 = vmul.f32 %v279_v61, %v178_v56  ;;  %vm196_vm6 = vweird.f32 %v279_v61 }
 0x225   :  { %vm197_vm8 = vmor %vm195_vm7, %vm196_vm6 }
 0x226   :  { %v188_v1 = vsel %vm187_vm5, %v277_v55, %v184_v62  ;;  %v191_v2 = vmul.f32 %v279_v61, %v190_v63 }
 0x227   :  { %v199_v3 = vmul.f32 %v188_v1, %v165_v42 }
 0x228   :  { %v192_v5 = vmul.f32 0.5, %v191_v2 }
 0x229   :  { %v205_v6 = vmul.f32 %v272_v0, %v199_v3 }
 0x22a   :  { %v193_v7 = vsub.f32 1.5, %v192_v5 }
 0x22b   :  { %v211_v8 = vadd.f32 %v273_v4, %v205_v6 }
 0x22c   :  { %v194_v9 = vmul.f32 %v279_v61, %v193_v7 }
 0x22d   :  { %213 = vst.msk [vmem:[#allocation3] sm:$0xff] %vm32_vm0, %v211_v8 }
 0x22e   :  { %v198_v10 = vsel %vm197_vm8, %v279_v61, %v194_v9 }
 0x22f   :  { %v200_v11 = vmul.f32 %v198_v10, %v166_v47 }
 0x231   :  { %v206_v12 = vmul.f32 %v272_v0, %v200_v11 }
 0x233   :  { %v212_v13 = vadd.f32 %v273_v4, %v206_v12 }
 0x235   :  { %214 = vst.msk [vmem:[#allocation3 + $0x8] sm:$0xff] %vm32_vm0, %v212_v13 }
 0x236   :  { %227 = dma.vmem_to_hbm [thread:$0]  %s220_s20, 256, %s222_s23, [#allocation4], %s309_s6, %s309_s6, %s310_s24  }
 0x237   :  { %304 = dma.done.wait [#allocation4], 256  }
 0x238   :  { %305 = vsyncadd [#allocation4], 4294967040 }
 0x239   :  { %232 = vsyncpa [#allocation4], 1 }

</bundles_post_ra>
